<compile_context>
chip_gen: v5e
topology: v5e:2x2
jax: 0.10.0
libtpu: 0.0.40
codegen_flags: <defaults>
</compile_context>

<pallas_src>
from functools import partial

import numpy as np
import jax
import jax.numpy as jnp
from jax import lax
from jax.experimental import pallas as pl
from jax.experimental.pallas import tpu as pltpu


# ------------------------------------------------------------------ utilities

def get_sinusoid_encoding_table(n_position, d_hid):
    """Same math as the PyTorch reference (numpy, trace-time constant)."""
    def cal_angle(position, hid_idx):
        return position / np.power(10000, 2 * (hid_idx // 2) / d_hid)

    def get_posi_angle_vec(position):
        return [cal_angle(position, hid_j) for hid_j in range(d_hid)]

    table = np.array([get_posi_angle_vec(pos_i) for pos_i in range(n_position)])
    table[:, 0::2] = np.sin(table[:, 0::2])
    table[:, 1::2] = np.cos(table[:, 1::2])
    return jnp.asarray(table, dtype=jnp.float32)


def _layer_norm(x, g, b, eps=1e-5):
    # PyTorch nn.LayerNorm over the last dim (biased variance, eps=1e-5).
    mu = jnp.mean(x, axis=-1, keepdims=True)
    var = jnp.mean(jnp.square(x - mu), axis=-1, keepdims=True)
    return (x - mu) * lax.rsqrt(var + eps) * g + b


def _conv1d_im2col(x, w_flat, b, K, t_idx):
    """'same' Conv1d along axis 0 via im2col.

    x: (S, C_in) f32; w_flat: (K*C_in, C_out) bf16 (reshaped (K, C_in, C_out));
    b: (1, C_out) f32; t_idx: (S, 1) int32 row-index iota (hoisted by caller).
    == PyTorch nn.Conv1d(C_in, C_out, K, padding=(K-1)//2) applied along time.
    """
    S = x.shape[0]
    p = (K - 1) // 2
    cols = []
    for j in range(K):
        o = j - p                                   # input offset for this tap
        if o == 0:
            cols.append(x)
        else:
            shifted = pltpu.roll(x, shift=(-o) % S, axis=0)  # shifted[t] = x[(t+o) mod S]
            valid = (t_idx + o >= 0) & (t_idx + o < S)       # (S, 1) boundary mask
            cols.append(jnp.where(valid, shifted, 0.0))
    im = jnp.concatenate(cols, axis=1).astype(jnp.bfloat16)  # (S, K*C_in)
    y = jnp.dot(im, w_flat, preferred_element_type=jnp.float32)
    return y + b


# ------------------------------------------------------------------ the kernel

def encoder_stack_kernel(x_ref, mrow_ref, mcol_ref,
                         wqkv_ref, wo_ref, cw1_ref, cw2_ref, vec_ref,
                         out_ref, *, n_head, d_k, d_model, d_inner, k1, k2):
    D, F, H, dk = d_model, d_inner, n_head, d_k
    layer = pl.program_id(1)

    # Layer 0: pull the embedded input into the (VMEM-resident) output block.
    @pl.when(layer == 0)
    def _():
        out_ref[...] = x_ref[...]

    x = out_ref[0]                       # (S, D) f32, resident across layers
    S = x.shape[0]
    key_pad = mrow_ref[0]                # (1, S)  1.0 where the KEY position is padding
    keep = 1.0 - mcol_ref[0]             # (S, 1)  0.0 where THIS position is padding
    vec = vec_ref[0]                     # (10, max(D, F)) packed biases / LN params
    t_idx = lax.broadcasted_iota(jnp.int32, (S, 1), 0)   # hoisted for both convs

    # ---- fused QKV projection: one MXU push with N = 3D ----------------------
    qkv = jnp.dot(x.astype(jnp.bfloat16), wqkv_ref[0],
                  preferred_element_type=jnp.float32)     # (S, 3D)
    q = qkv[:, 0 * D:1 * D] + vec[0:1, :D]
    k = qkv[:, 1 * D:2 * D] + vec[1:2, :D]
    v = qkv[:, 2 * D:3 * D] + vec[2:3, :D]

    # ---- all heads in one batched dot_general --------------------------------
    q3 = jnp.stack([q[:, h * dk:(h + 1) * dk] for h in range(H)], 0)  # (H, S, dk)
    k3 = jnp.stack([k[:, h * dk:(h + 1) * dk] for h in range(H)], 0)
    v3 = jnp.stack([v[:, h * dk:(h + 1) * dk] for h in range(H)], 0)

    scores = jnp.einsum('hqd,hkd->hqk', q3.astype(jnp.bfloat16),
                        k3.astype(jnp.bfloat16),
                        preferred_element_type=jnp.float32)           # (H, S, S)
    scores = scores * (1.0 / float(np.sqrt(dk)))
    scores = jnp.where(key_pad[None, :, :] > 0.5, -1e30, scores)      # mask padded keys
    scores = scores - jnp.max(scores, axis=-1, keepdims=True)
    e = jnp.exp(scores)
    attn = e * pl.reciprocal(jnp.sum(e, axis=-1, keepdims=True), approx=True)
    ctx = jnp.einsum('hqk,hkd->hqd', attn.astype(jnp.bfloat16),
                     v3.astype(jnp.bfloat16),
                     preferred_element_type=jnp.float32)              # (H, S, dk)
    ctx = jnp.concatenate([ctx[h] for h in range(H)], axis=-1)        # (S, D)

    # ---- concat-of-heads output projection + residual + LN + mask ------------
    a = jnp.dot(ctx.astype(jnp.bfloat16), wo_ref[0],
                preferred_element_type=jnp.float32) + vec[3:4, :D]
    a = _layer_norm(a + x, vec[4:5, :D], vec[5:6, :D])
    a = a * keep                                      # masked_fill(mask, 0)

    # ---- position-wise conv feed-forward (im2col) -----------------------------
    h1 = _conv1d_im2col(a, cw1_ref[0], vec[6:7, :F], k1, t_idx)
    h1 = jnp.maximum(h1, 0.0)                         # ReLU
    h2 = _conv1d_im2col(h1, cw2_ref[0], vec[7:8, :D], k2, t_idx)
    y = _layer_norm(h2 + a, vec[8:9, :D], vec[9:10, :D])
    out_ref[0] = y * keep                             # masked_fill(mask, 0)


# ------------------------------------------------------------------ wrappers

def pack_encoder_layers(params, *, d_model, d_inner, k1, k2):
    """Stack per-layer weights along a leading layer axis; pack small vectors."""
    d_max = max(d_model, d_inner)

    def pad_row(v):
        return jnp.pad(v, ((0, 0), (0, d_max - v.shape[1])))

    wqkv, wo, cw1, cw2, vec = [], [], [], [], []
    for lp in params["layers"]:
        wqkv.append(jnp.concatenate([lp["wq"], lp["wk"], lp["wv"]], axis=1))
        wo.append(lp["wo"])
        cw1.append(lp["cw1"].reshape(k1 * d_model, d_inner))
        cw2.append(lp["cw2"].reshape(k2 * d_inner, d_model))
        vec.append(jnp.concatenate([
            pad_row(lp["bq"]), pad_row(lp["bk"]), pad_row(lp["bv"]),
            pad_row(lp["bo"]), pad_row(lp["ln1_g"]), pad_row(lp["ln1_b"]),
            pad_row(lp["cb1"]), pad_row(lp["cb2"]),
            pad_row(lp["ln2_g"]), pad_row(lp["ln2_b"])], axis=0))   # (10, d_max)
    return (jnp.stack(wqkv).astype(jnp.bfloat16),
            jnp.stack(wo).astype(jnp.bfloat16),
            jnp.stack(cw1).astype(jnp.bfloat16),
            jnp.stack(cw2).astype(jnp.bfloat16),
            jnp.stack(vec).astype(jnp.float32))


def encoder_stack(x, mask_row, mask_col, wqkv, wo, cw1, cw2, vec,
                  *, n_head, d_k, d_inner, k1, k2):
    B, S, D = x.shape
    L = wqkv.shape[0]
    NV, DM = vec.shape[1], vec.shape[2]
    kern = partial(encoder_stack_kernel, n_head=n_head, d_k=d_k,
                   d_model=D, d_inner=d_inner, k1=k1, k2=k2)
    return pl.pallas_call(
        kern,
        out_shape=jax.ShapeDtypeStruct((B, S, D), jnp.float32),
        grid=(B, L),                       # batch parallel, layers sequential
        in_specs=[
            pl.BlockSpec((1, S, D), lambda b, l: (b, 0, 0)),            # x
            pl.BlockSpec((1, 1, S), lambda b, l: (b, 0, 0)),            # key-pad mask
            pl.BlockSpec((1, S, 1), lambda b, l: (b, 0, 0)),            # output mask
            pl.BlockSpec((1, D, 3 * D), lambda b, l: (l, 0, 0)),        # fused QKV
            pl.BlockSpec((1, D, D), lambda b, l: (l, 0, 0)),            # out proj
            pl.BlockSpec((1, k1 * D, d_inner), lambda b, l: (l, 0, 0)),  # conv1 (im2col)
            pl.BlockSpec((1, k2 * d_inner, D), lambda b, l: (l, 0, 0)),  # conv2 (im2col)
            pl.BlockSpec((1, NV, DM), lambda b, l: (l, 0, 0)),          # packed vectors
        ],
        out_specs=pl.BlockSpec((1, S, D), lambda b, l: (b, 0, 0)),
        compiler_params=pltpu.CompilerParams(
            dimension_semantics=("parallel", "arbitrary"),
            vmem_limit_bytes=32 * 1024 * 1024),
    )(x, mask_row, mask_col, wqkv, wo, cw1, cw2, vec)


def init_encoder_params(key, *, num_vocab, d_model, n_layers, n_head, d_inner,
                        kernel_size, max_seq_len):
    d_k = d_model // n_head
    keys = jax.random.split(key, 1 + n_layers)
    s = 0.1
    word_emb = s * jax.random.normal(keys[0], (num_vocab, d_model), jnp.float32)
    word_emb = word_emb.at[0].set(0.0)  # nn.Embedding padding_idx=0
    params = {
        "word_emb": word_emb,
        "pos_enc": get_sinusoid_encoding_table(max_seq_len + 1, d_model),
        "layers": [],
    }
    for li in range(n_layers):
        lk = jax.random.split(keys[1 + li], 6)
        layer = dict(
            wq=s * jax.random.normal(lk[0], (d_model, n_head * d_k), jnp.float32),
            bq=jnp.zeros((1, n_head * d_k), jnp.float32),
            wk=s * jax.random.normal(lk[1], (d_model, n_head * d_k), jnp.float32),
            bk=jnp.zeros((1, n_head * d_k), jnp.float32),
            wv=s * jax.random.normal(lk[2], (d_model, n_head * d_k), jnp.float32),
            bv=jnp.zeros((1, n_head * d_k), jnp.float32),
            wo=s * jax.random.normal(lk[3], (n_head * d_k, d_model), jnp.float32),
            bo=jnp.zeros((1, d_model), jnp.float32),
            ln1_g=jnp.ones((1, d_model), jnp.float32),
            ln1_b=jnp.zeros((1, d_model), jnp.float32),
            cw1=s * jax.random.normal(lk[4], (kernel_size[0], d_model, d_inner), jnp.float32),
            cb1=jnp.zeros((1, d_inner), jnp.float32),
            cw2=s * jax.random.normal(lk[5], (kernel_size[1], d_inner, d_model), jnp.float32),
            cb2=jnp.zeros((1, d_model), jnp.float32),
            ln2_g=jnp.ones((1, d_model), jnp.float32),
            ln2_b=jnp.zeros((1, d_model), jnp.float32),
        )
        params["layers"].append(layer)
    return params


def encoder_forward(src_seq, mask, params, *, n_head, d_k, d_inner, kernel_size):
    """src_seq: (B, S) int32 tokens; mask: (B, S) bool, True = padding."""
    # WordEncoder with accent_info=0 == plain nn.Embedding(padding_idx=0).
    # TODO(synk): accent_info > 0 path (separate accent embedding / split dim) not implemented.
    B, S = src_seq.shape
    D = params["word_emb"].shape[1]
    x = jnp.take(params["word_emb"], src_seq, axis=0)          # (B, S, D)
    if S > params["pos_enc"].shape[0] - 1:                     # eval, seq longer than table
        pos = get_sinusoid_encoding_table(S, D)[None, :S, :]
    else:
        pos = params["pos_enc"][None, :S, :]                   # position_enc[:, :max_len, :]
    x = x + pos

    mask_f = mask.astype(jnp.float32)
    mask_row = mask_f[:, None, :]                              # (B, 1, S) — key mask
    mask_col = mask_f[:, :, None]                              # (B, S, 1) — output zeroing

    wqkv, wo, cw1, cw2, vec = pack_encoder_layers(
        params, d_model=D, d_inner=d_inner, k1=kernel_size[0], k2=kernel_size[1])
    return encoder_stack(x, mask_row, mask_col, wqkv, wo, cw1, cw2, vec,
                         n_head=n_head, d_k=d_k, d_inner=d_inner,
                         k1=kernel_size[0], k2=kernel_size[1])


# ------------------------------------------------------------------ main

if __name__ == "__main__":
    key = jax.random.PRNGKey(0)
    B, S = 2, 16
    max_seq_len, num_vocab = 32, 40
    d_model, n_layers, n_head = 32, 2, 2
    d_inner, kernel_size = 64, (3, 3)
    d_k = d_model // n_head

    k_tok, k_par = jax.random.split(key)
    src_seq = jax.random.randint(k_tok, (B, S), 1, num_vocab, dtype=jnp.int32)
    # pad the tail of the second sequence (token id 0 == padding)
    col = jnp.arange(S)[None, :]
    src_seq = jnp.where((jnp.arange(B)[:, None] == 1) & (col >= 10), 0, src_seq)
    mask = (src_seq == 0)

    params = init_encoder_params(
        k_par, num_vocab=num_vocab, d_model=d_model, n_layers=n_layers,
        n_head=n_head, d_inner=d_inner, kernel_size=kernel_size,
        max_seq_len=max_seq_len)

    out = encoder_forward(src_seq, mask, params, n_head=n_head, d_k=d_k,
                          d_inner=d_inner, kernel_size=kernel_size)
    out = jax.block_until_ready(out)
    assert out.shape == (B, S, d_model)
    assert bool(jnp.all(jnp.isfinite(out)))
    print("KERNEL_OK")
</pallas_src>

<mosaic_0001>
module attributes {stable_mosaic.version = 11 : i64} {
  func.func @encoder_stack_kernel(%arg0: i32, %arg1: i32, %arg2: memref<1x16x32xf32, #tpu.memory_space<vmem>>, %arg3: memref<1x1x16xf32, #tpu.memory_space<vmem>>, %arg4: memref<1x16x1xf32, #tpu.memory_space<vmem>>, %arg5: memref<1x32x96xbf16, #tpu.memory_space<vmem>>, %arg6: memref<1x32x32xbf16, #tpu.memory_space<vmem>>, %arg7: memref<1x96x64xbf16, #tpu.memory_space<vmem>>, %arg8: memref<1x192x32xbf16, #tpu.memory_space<vmem>>, %arg9: memref<1x10x64xf32, #tpu.memory_space<vmem>>, %arg10: memref<1x16x32xf32, #tpu.memory_space<vmem>>) attributes {dimension_semantics = [#tpu.dimension_semantics<parallel>, #tpu.dimension_semantics<arbitrary>], iteration_bounds = array<i64: 2, 2>, scalar_prefetch = 0 : i64, scratch_operands = 0 : i64, tpu.core_type = #tpu.core_type<tc>, window_params = [{transform_indices = @transform_0, window_bounds = array<i64: 1, 16, 32>}, {transform_indices = @transform_1, window_bounds = array<i64: 1, 1, 16>}, {transform_indices = @transform_2, window_bounds = array<i64: 1, 16, 1>}, {transform_indices = @transform_3, window_bounds = array<i64: 1, 32, 96>}, {transform_indices = @transform_4, window_bounds = array<i64: 1, 32, 32>}, {transform_indices = @transform_5, window_bounds = array<i64: 1, 96, 64>}, {transform_indices = @transform_6, window_bounds = array<i64: 1, 192, 32>}, {transform_indices = @transform_7, window_bounds = array<i64: 1, 10, 64>}, {transform_indices = @transform_8, window_bounds = array<i64: 1, 16, 32>}]} {
    %c0_i32 = arith.constant 0 : i32
    %0 = arith.cmpi eq, %arg1, %c0_i32 : i32
    %1 = arith.extui %0 : i1 to i32
    %c0_i32_0 = arith.constant 0 : i32
    %2 = arith.cmpi ne, %1, %c0_i32_0 : i32
    scf.if %2 {
      %c0_69 = arith.constant 0 : index
      %c0_70 = arith.constant 0 : index
      %c0_71 = arith.constant 0 : index
      %213 = vector.load %arg2[%c0_69, %c0_70, %c0_71] : memref<1x16x32xf32, #tpu.memory_space<vmem>>, vector<1x16x32xf32>
      %c0_72 = arith.constant 0 : index
      %c0_73 = arith.constant 0 : index
      %c0_74 = arith.constant 0 : index
      %214 = vector.load %arg10[%c0_72, %c0_73, %c0_74] : memref<1x16x32xf32, #tpu.memory_space<vmem>>, vector<1x16x32xf32>
      tpu.vector_store %arg10[%c0_72, %c0_73, %c0_74], %213 {strides = array<i32>} : memref<1x16x32xf32, #tpu.memory_space<vmem>>, vector<1x16x32xf32>,
    } else {
    }
    %c0 = arith.constant 0 : index
    %c0_1 = arith.constant 0 : index
    %c0_2 = arith.constant 0 : index
    %3 = vector.load %arg10[%c0, %c0_1, %c0_2] : memref<1x16x32xf32, #tpu.memory_space<vmem>>, vector<1x16x32xf32>
    %4 = vector.shape_cast %3 : vector<1x16x32xf32> to vector<16x32xf32>
    %c0_3 = arith.constant 0 : index
    %c0_4 = arith.constant 0 : index
    %c0_5 = arith.constant 0 : index
    %5 = vector.load %arg3[%c0_3, %c0_4, %c0_5] : memref<1x1x16xf32, #tpu.memory_space<vmem>>, vector<1x1x16xf32>
    %6 = vector.shape_cast %5 : vector<1x1x16xf32> to vector<1x16xf32>
    %c0_6 = arith.constant 0 : index
    %c0_7 = arith.constant 0 : index
    %c0_8 = arith.constant 0 : index
    %7 = vector.load %arg4[%c0_6, %c0_7, %c0_8] : memref<1x16x1xf32, #tpu.memory_space<vmem>>, vector<1x16x1xf32>
    %8 = vector.shape_cast %7 : vector<1x16x1xf32> to vector<16x1xf32>
    %cst = arith.constant 1.000000e+00 : f32
    %9 = vector.broadcast %cst : f32 to vector<16x1xf32>
    %10 = arith.subf %9, %8 : vector<16x1xf32>
    %c0_9 = arith.constant 0 : index
    %c0_10 = arith.constant 0 : index
    %c0_11 = arith.constant 0 : index
    %11 = vector.load %arg9[%c0_9, %c0_10, %c0_11] : memref<1x10x64xf32, #tpu.memory_space<vmem>>, vector<1x10x64xf32>
    %12 = vector.shape_cast %11 : vector<1x10x64xf32> to vector<10x64xf32>
    %13 = tpu.iota {dimensions = array<i32: 0>} : vector<16x1xi32>
    %14 = arith.truncf %4 : vector<16x32xf32> to vector<16x32xbf16>
    %c0_12 = arith.constant 0 : index
    %c0_13 = arith.constant 0 : index
    %c0_14 = arith.constant 0 : index
    %15 = vector.load %arg5[%c0_12, %c0_13, %c0_14] : memref<1x32x96xbf16, #tpu.memory_space<vmem>>, vector<1x32x96xbf16>
    %16 = vector.shape_cast %15 : vector<1x32x96xbf16> to vector<32x96xbf16>
    %cst_15 = arith.constant dense<0.000000e+00> : vector<16x96xf32>
    %17 = tpu.matmul %14, %16, %cst_15 {dimension_numbers = #tpu.dot_dimension_numbers<[1], [0], [0], [1], [0, 0, 1, 1], [], []>} : vector<16x32xbf16>, vector<32x96xbf16>, vector<16x96xf32> -> vector<16x96xf32>
    %18 = vector.extract_strided_slice %17 {offsets = [0, 0], sizes = [16, 32], strides = [1, 1]} : vector<16x96xf32> to vector<16x32xf32>
    %19 = vector.extract_strided_slice %12 {offsets = [0, 0], sizes = [1, 32], strides = [1, 1]} : vector<10x64xf32> to vector<1x32xf32>
    %20 = vector.broadcast %19 : vector<1x32xf32> to vector<16x32xf32>
    %21 = arith.addf %18, %20 : vector<16x32xf32>
    %22 = vector.extract_strided_slice %17 {offsets = [0, 32], sizes = [16, 32], strides = [1, 1]} : vector<16x96xf32> to vector<16x32xf32>
    %23 = vector.extract_strided_slice %12 {offsets = [1, 0], sizes = [1, 32], strides = [1, 1]} : vector<10x64xf32> to vector<1x32xf32>
    %24 = vector.broadcast %23 : vector<1x32xf32> to vector<16x32xf32>
    %25 = arith.addf %22, %24 : vector<16x32xf32>
    %26 = vector.extract_strided_slice %17 {offsets = [0, 64], sizes = [16, 32], strides = [1, 1]} : vector<16x96xf32> to vector<16x32xf32>
    %27 = vector.extract_strided_slice %12 {offsets = [2, 0], sizes = [1, 32], strides = [1, 1]} : vector<10x64xf32> to vector<1x32xf32>
    %28 = vector.broadcast %27 : vector<1x32xf32> to vector<16x32xf32>
    %29 = arith.addf %26, %28 : vector<16x32xf32>
    %30 = vector.extract_strided_slice %21 {offsets = [0, 0], sizes = [16, 16], strides = [1, 1]} : vector<16x32xf32> to vector<16x16xf32>
    %31 = vector.extract_strided_slice %21 {offsets = [0, 16], sizes = [16, 16], strides = [1, 1]} : vector<16x32xf32> to vector<16x16xf32>
    %32 = vector.shape_cast %30 : vector<16x16xf32> to vector<1x16x16xf32>
    %33 = vector.shape_cast %31 : vector<16x16xf32> to vector<1x16x16xf32>
    %34 = tpu.concatenate %32, %33 in 0 : vector<1x16x16xf32>, vector<1x16x16xf32> -> vector<2x16x16xf32>
    %35 = vector.extract_strided_slice %25 {offsets = [0, 0], sizes = [16, 16], strides = [1, 1]} : vector<16x32xf32> to vector<16x16xf32>
    %36 = vector.extract_strided_slice %25 {offsets = [0, 16], sizes = [16, 16], strides = [1, 1]} : vector<16x32xf32> to vector<16x16xf32>
    %37 = vector.shape_cast %35 : vector<16x16xf32> to vector<1x16x16xf32>
    %38 = vector.shape_cast %36 : vector<16x16xf32> to vector<1x16x16xf32>
    %39 = tpu.concatenate %37, %38 in 0 : vector<1x16x16xf32>, vector<1x16x16xf32> -> vector<2x16x16xf32>
    %40 = vector.extract_strided_slice %29 {offsets = [0, 0], sizes = [16, 16], strides = [1, 1]} : vector<16x32xf32> to vector<16x16xf32>
    %41 = vector.extract_strided_slice %29 {offsets = [0, 16], sizes = [16, 16], strides = [1, 1]} : vector<16x32xf32> to vector<16x16xf32>
    %42 = vector.shape_cast %40 : vector<16x16xf32> to vector<1x16x16xf32>
    %43 = vector.shape_cast %41 : vector<16x16xf32> to vector<1x16x16xf32>
    %44 = tpu.concatenate %42, %43 in 0 : vector<1x16x16xf32>, vector<1x16x16xf32> -> vector<2x16x16xf32>
    %45 = arith.truncf %34 : vector<2x16x16xf32> to vector<2x16x16xbf16>
    %46 = arith.truncf %39 : vector<2x16x16xf32> to vector<2x16x16xbf16>
    "tpu.trace_start"() <{level = 10 : i32, message = "hqd,hkd->hqk"}> : () -> ()
    %cst_16 = arith.constant dense<0.000000e+00> : vector<2x16x16xf32>
    %47 = tpu.matmul %45, %46, %cst_16 {dimension_numbers = #tpu.dot_dimension_numbers<[2], [2], [1], [1], [0, 0, 0, 1, 1, 1], [0], [0]>} : vector<2x16x16xbf16>, vector<2x16x16xbf16>, vector<2x16x16xf32> -> vector<2x16x16xf32>
    "tpu.trace_stop"() : () -> ()
    %cst_17 = arith.constant 2.500000e-01 : f32
    %48 = vector.broadcast %cst_17 : f32 to vector<2x16x16xf32>
    %49 = arith.mulf %47, %48 : vector<2x16x16xf32>
    %50 = vector.shape_cast %6 : vector<1x16xf32> to vector<1x1x16xf32>
    %cst_18 = arith.constant 5.000000e-01 : f32
    %51 = vector.broadcast %cst_18 : f32 to vector<1x1x16xf32>
    %52 = arith.cmpf ogt, %50, %51 : vector<1x1x16xf32>
    %cst_19 = arith.constant -1.000000e+30 : f32
    %53 = vector.shape_cast %52 : vector<1x1x16xi1> to vector<1x1x16xi1>
    %54 = vector.broadcast %53 : vector<1x1x16xi1> to vector<2x16x16xi1>
    %55 = vector.broadcast %cst_19 : f32 to vector<2x16x16xf32>
    %56 = arith.select %54, %55, %49 : vector<2x16x16xi1>, vector<2x16x16xf32>
    %cst_20 = arith.constant dense<0xFF800000> : vector<2x16xf32>
    %57 = vector.multi_reduction <maximumf>, %56, %cst_20 [2] : vector<2x16x16xf32> to vector<2x16xf32>
    %58 = vector.shape_cast %57 : vector<2x16xf32> to vector<2x16x1xf32>
    %59 = vector.broadcast %58 : vector<2x16x1xf32> to vector<2x16x16xf32>
    %60 = arith.subf %56, %59 : vector<2x16x16xf32>
    %61 = math.exp %60 : vector<2x16x16xf32>
    %cst_21 = arith.constant dense<0.000000e+00> : vector<2x16xf32>
    %62 = vector.multi_reduction <add>, %61, %cst_21 [2] : vector<2x16x16xf32> to vector<2x16xf32>
    %63 = vector.shape_cast %62 : vector<2x16xf32> to vector<2x16x1xf32>
    %64 = tpu.reciprocal %63 {approx = true} : vector<2x16x1xf32> -> vector<2x16x1xf32>
    %65 = vector.broadcast %64 : vector<2x16x1xf32> to vector<2x16x16xf32>
    %66 = arith.mulf %61, %65 : vector<2x16x16xf32>
    %67 = arith.truncf %66 : vector<2x16x16xf32> to vector<2x16x16xbf16>
    %68 = arith.truncf %44 : vector<2x16x16xf32> to vector<2x16x16xbf16>
    "tpu.trace_start"() <{level = 10 : i32, message = "hqk,hkd->hqd"}> : () -> ()
    %cst_22 = arith.constant dense<0.000000e+00> : vector<2x16x16xf32>
    %69 = tpu.matmul %67, %68, %cst_22 {dimension_numbers = #tpu.dot_dimension_numbers<[2], [1], [1], [2], [0, 0, 0, 1, 1, 2], [0], [0]>} : vector<2x16x16xbf16>, vector<2x16x16xbf16>, vector<2x16x16xf32> -> vector<2x16x16xf32>
    "tpu.trace_stop"() : () -> ()
    %70 = vector.extract_strided_slice %69 {offsets = [0, 0, 0], sizes = [1, 16, 16], strides = [1, 1, 1]} : vector<2x16x16xf32> to vector<1x16x16xf32>
    %71 = vector.shape_cast %70 : vector<1x16x16xf32> to vector<16x16xf32>
    %72 = vector.extract_strided_slice %69 {offsets = [1, 0, 0], sizes = [1, 16, 16], strides = [1, 1, 1]} : vector<2x16x16xf32> to vector<1x16x16xf32>
    %73 = vector.shape_cast %72 : vector<1x16x16xf32> to vector<16x16xf32>
    %74 = tpu.concatenate %71, %73 in 1 : vector<16x16xf32>, vector<16x16xf32> -> vector<16x32xf32>
    %75 = arith.truncf %74 : vector<16x32xf32> to vector<16x32xbf16>
    %c0_23 = arith.constant 0 : index
    %c0_24 = arith.constant 0 : index
    %c0_25 = arith.constant 0 : index
    %76 = vector.load %arg6[%c0_23, %c0_24, %c0_25] : memref<1x32x32xbf16, #tpu.memory_space<vmem>>, vector<1x32x32xbf16>
    %77 = vector.shape_cast %76 : vector<1x32x32xbf16> to vector<32x32xbf16>
    %cst_26 = arith.constant dense<0.000000e+00> : vector<16x32xf32>
    %78 = tpu.matmul %75, %77, %cst_26 {dimension_numbers = #tpu.dot_dimension_numbers<[1], [0], [0], [1], [0, 0, 1, 1], [], []>} : vector<16x32xbf16>, vector<32x32xbf16>, vector<16x32xf32> -> vector<16x32xf32>
    %79 = vector.extract_strided_slice %12 {offsets = [3, 0], sizes = [1, 32], strides = [1, 1]} : vector<10x64xf32> to vector<1x32xf32>
    %80 = vector.broadcast %79 : vector<1x32xf32> to vector<16x32xf32>
    %81 = arith.addf %78, %80 : vector<16x32xf32>
    %82 = arith.addf %81, %4 : vector<16x32xf32>
    %83 = vector.extract_strided_slice %12 {offsets = [4, 0], sizes = [1, 32], strides = [1, 1]} : vector<10x64xf32> to vector<1x32xf32>
    %84 = vector.extract_strided_slice %12 {offsets = [5, 0], sizes = [1, 32], strides = [1, 1]} : vector<10x64xf32> to vector<1x32xf32>
    %cst_27 = arith.constant dense<0.000000e+00> : vector<16xf32>
    %85 = vector.multi_reduction <add>, %82, %cst_27 [1] : vector<16x32xf32> to vector<16xf32>
    %86 = vector.shape_cast %85 : vector<16xf32> to vector<16x1xf32>
    %cst_28 = arith.constant 3.200000e+01 : f32
    %87 = vector.broadcast %cst_28 : f32 to vector<16x1xf32>
    %88 = arith.divf %86, %87 : vector<16x1xf32>
    %89 = vector.broadcast %88 : vector<16x1xf32> to vector<16x32xf32>
    %90 = arith.subf %82, %89 : vector<16x32xf32>
    %91 = arith.mulf %90, %90 : vector<16x32xf32>
    %cst_29 = arith.constant dense<0.000000e+00> : vector<16xf32>
    %92 = vector.multi_reduction <add>, %91, %cst_29 [1] : vector<16x32xf32> to vector<16xf32>
    %93 = vector.shape_cast %92 : vector<16xf32> to vector<16x1xf32>
    %cst_30 = arith.constant 3.200000e+01 : f32
    %94 = vector.broadcast %cst_30 : f32 to vector<16x1xf32>
    %95 = arith.divf %93, %94 : vector<16x1xf32>
    %96 = vector.broadcast %88 : vector<16x1xf32> to vector<16x32xf32>
    %97 = arith.subf %82, %96 : vector<16x32xf32>
    %cst_31 = arith.constant 9.99999974E-6 : f32
    %98 = vector.broadcast %cst_31 : f32 to vector<16x1xf32>
    %99 = arith.addf %95, %98 : vector<16x1xf32>
    %100 = math.rsqrt %99 : vector<16x1xf32>
    %101 = vector.broadcast %100 : vector<16x1xf32> to vector<16x32xf32>
    %102 = arith.mulf %97, %101 : vector<16x32xf32>
    %103 = vector.broadcast %83 : vector<1x32xf32> to vector<16x32xf32>
    %104 = arith.mulf %102, %103 : vector<16x32xf32>
    %105 = vector.broadcast %84 : vector<1x32xf32> to vector<16x32xf32>
    %106 = arith.addf %104, %105 : vector<16x32xf32>
    %107 = vector.broadcast %10 : vector<16x1xf32> to vector<16x32xf32>
    %108 = arith.mulf %106, %107 : vector<16x32xf32>
    %c0_32 = arith.constant 0 : index
    %c0_33 = arith.constant 0 : index
    %c0_34 = arith.constant 0 : index
    %109 = vector.load %arg7[%c0_32, %c0_33, %c0_34] : memref<1x96x64xbf16, #tpu.memory_space<vmem>>, vector<1x96x64xbf16>
    %110 = vector.shape_cast %109 : vector<1x96x64xbf16> to vector<96x64xbf16>
    %111 = vector.extract_strided_slice %12 {offsets = [6, 0], sizes = [1, 64], strides = [1, 1]} : vector<10x64xf32> to vector<1x64xf32>
    %c1_i32 = arith.constant 1 : i32
    %112 = tpu.dynamic_rotate %108 by %c1_i32 dim 0 : vector<16x32xf32>, i32 -> vector<16x32xf32>
    %c-1_i32 = arith.constant -1 : i32
    %113 = vector.broadcast %c-1_i32 : i32 to vector<16x1xi32>
    %114 = arith.addi %13, %113 : vector<16x1xi32>
    %c0_i32_35 = arith.constant 0 : i32
    %115 = vector.broadcast %c0_i32_35 : i32 to vector<16x1xi32>
    %116 = arith.cmpi sge, %114, %115 : vector<16x1xi32>
    %c-1_i32_36 = arith.constant -1 : i32
    %117 = vector.broadcast %c-1_i32_36 : i32 to vector<16x1xi32>
    %118 = arith.addi %13, %117 : vector<16x1xi32>
    %c16_i32 = arith.constant 16 : i32
    %119 = vector.broadcast %c16_i32 : i32 to vector<16x1xi32>
    %120 = arith.cmpi slt, %118, %119 : vector<16x1xi32>
    %121 = arith.andi %116, %120 : vector<16x1xi1>
    %cst_37 = arith.constant 0.000000e+00 : f32
    %122 = vector.shape_cast %121 : vector<16x1xi1> to vector<16x1xi1>
    %123 = vector.broadcast %122 : vector<16x1xi1> to vector<16x32xi1>
    %124 = vector.broadcast %cst_37 : f32 to vector<16x32xf32>
    %125 = arith.select %123, %112, %124 : vector<16x32xi1>, vector<16x32xf32>
    %c15_i32 = arith.constant 15 : i32
    %126 = tpu.dynamic_rotate %108 by %c15_i32 dim 0 : vector<16x32xf32>, i32 -> vector<16x32xf32>
    %c1_i32_38 = arith.constant 1 : i32
    %127 = vector.broadcast %c1_i32_38 : i32 to vector<16x1xi32>
    %128 = arith.addi %13, %127 : vector<16x1xi32>
    %c0_i32_39 = arith.constant 0 : i32
    %129 = vector.broadcast %c0_i32_39 : i32 to vector<16x1xi32>
    %130 = arith.cmpi sge, %128, %129 : vector<16x1xi32>
    %c1_i32_40 = arith.constant 1 : i32
    %131 = vector.broadcast %c1_i32_40 : i32 to vector<16x1xi32>
    %132 = arith.addi %13, %131 : vector<16x1xi32>
    %c16_i32_41 = arith.constant 16 : i32
    %133 = vector.broadcast %c16_i32_41 : i32 to vector<16x1xi32>
    %134 = arith.cmpi slt, %132, %133 : vector<16x1xi32>
    %135 = arith.andi %130, %134 : vector<16x1xi1>
    %cst_42 = arith.constant 0.000000e+00 : f32
    %136 = vector.shape_cast %135 : vector<16x1xi1> to vector<16x1xi1>
    %137 = vector.broadcast %136 : vector<16x1xi1> to vector<16x32xi1>
    %138 = vector.broadcast %cst_42 : f32 to vector<16x32xf32>
    %139 = arith.select %137, %126, %138 : vector<16x32xi1>, vector<16x32xf32>
    %140 = tpu.concatenate %125, %108, %139 in 1 : vector<16x32xf32>, vector<16x32xf32>, vector<16x32xf32> -> vector<16x96xf32>
    %141 = arith.truncf %140 : vector<16x96xf32> to vector<16x96xbf16>
    %cst_43 = arith.constant dense<0.000000e+00> : vector<16x64xf32>
    %142 = tpu.matmul %141, %110, %cst_43 {dimension_numbers = #tpu.dot_dimension_numbers<[1], [0], [0], [1], [0, 0, 1, 1], [], []>} : vector<16x96xbf16>, vector<96x64xbf16>, vector<16x64xf32> -> vector<16x64xf32>
    %143 = vector.broadcast %111 : vector<1x64xf32> to vector<16x64xf32>
    %144 = arith.addf %142, %143 : vector<16x64xf32>
    %cst_44 = arith.constant 0.000000e+00 : f32
    %145 = vector.broadcast %cst_44 : f32 to vector<16x64xf32>
    %146 = arith.maximumf %144, %145 : vector<16x64xf32>
    %c0_45 = arith.constant 0 : index
    %c0_46 = arith.constant 0 : index
    %c0_47 = arith.constant 0 : index
    %147 = vector.load %arg8[%c0_45, %c0_46, %c0_47] : memref<1x192x32xbf16, #tpu.memory_space<vmem>>, vector<1x192x32xbf16>
    %148 = vector.shape_cast %147 : vector<1x192x32xbf16> to vector<192x32xbf16>
    %149 = vector.extract_strided_slice %12 {offsets = [7, 0], sizes = [1, 32], strides = [1, 1]} : vector<10x64xf32> to vector<1x32xf32>
    %c1_i32_48 = arith.constant 1 : i32
    %150 = tpu.dynamic_rotate %146 by %c1_i32_48 dim 0 : vector<16x64xf32>, i32 -> vector<16x64xf32>
    %c-1_i32_49 = arith.constant -1 : i32
    %151 = vector.broadcast %c-1_i32_49 : i32 to vector<16x1xi32>
    %152 = arith.addi %13, %151 : vector<16x1xi32>
    %c0_i32_50 = arith.constant 0 : i32
    %153 = vector.broadcast %c0_i32_50 : i32 to vector<16x1xi32>
    %154 = arith.cmpi sge, %152, %153 : vector<16x1xi32>
    %c-1_i32_51 = arith.constant -1 : i32
    %155 = vector.broadcast %c-1_i32_51 : i32 to vector<16x1xi32>
    %156 = arith.addi %13, %155 : vector<16x1xi32>
    %c16_i32_52 = arith.constant 16 : i32
    %157 = vector.broadcast %c16_i32_52 : i32 to vector<16x1xi32>
    %158 = arith.cmpi slt, %156, %157 : vector<16x1xi32>
    %159 = arith.andi %154, %158 : vector<16x1xi1>
    %cst_53 = arith.constant 0.000000e+00 : f32
    %160 = vector.shape_cast %159 : vector<16x1xi1> to vector<16x1xi1>
    %161 = vector.broadcast %160 : vector<16x1xi1> to vector<16x64xi1>
    %162 = vector.broadcast %cst_53 : f32 to vector<16x64xf32>
    %163 = arith.select %161, %150, %162 : vector<16x64xi1>, vector<16x64xf32>
    %c15_i32_54 = arith.constant 15 : i32
    %164 = tpu.dynamic_rotate %146 by %c15_i32_54 dim 0 : vector<16x64xf32>, i32 -> vector<16x64xf32>
    %c1_i32_55 = arith.constant 1 : i32
    %165 = vector.broadcast %c1_i32_55 : i32 to vector<16x1xi32>
    %166 = arith.addi %13, %165 : vector<16x1xi32>
    %c0_i32_56 = arith.constant 0 : i32
    %167 = vector.broadcast %c0_i32_56 : i32 to vector<16x1xi32>
    %168 = arith.cmpi sge, %166, %167 : vector<16x1xi32>
    %c1_i32_57 = arith.constant 1 : i32
    %169 = vector.broadcast %c1_i32_57 : i32 to vector<16x1xi32>
    %170 = arith.addi %13, %169 : vector<16x1xi32>
    %c16_i32_58 = arith.constant 16 : i32
    %171 = vector.broadcast %c16_i32_58 : i32 to vector<16x1xi32>
    %172 = arith.cmpi slt, %170, %171 : vector<16x1xi32>
    %173 = arith.andi %168, %172 : vector<16x1xi1>
    %cst_59 = arith.constant 0.000000e+00 : f32
    %174 = vector.shape_cast %173 : vector<16x1xi1> to vector<16x1xi1>
    %175 = vector.broadcast %174 : vector<16x1xi1> to vector<16x64xi1>
    %176 = vector.broadcast %cst_59 : f32 to vector<16x64xf32>
    %177 = arith.select %175, %164, %176 : vector<16x64xi1>, vector<16x64xf32>
    %178 = tpu.concatenate %163, %146, %177 in 1 : vector<16x64xf32>, vector<16x64xf32>, vector<16x64xf32> -> vector<16x192xf32>
    %179 = arith.truncf %178 : vector<16x192xf32> to vector<16x192xbf16>
    %cst_60 = arith.constant dense<0.000000e+00> : vector<16x32xf32>
    %180 = tpu.matmul %179, %148, %cst_60 {dimension_numbers = #tpu.dot_dimension_numbers<[1], [0], [0], [1], [0, 0, 1, 1], [], []>} : vector<16x192xbf16>, vector<192x32xbf16>, vector<16x32xf32> -> vector<16x32xf32>
    %181 = vector.broadcast %149 : vector<1x32xf32> to vector<16x32xf32>
    %182 = arith.addf %180, %181 : vector<16x32xf32>
    %183 = arith.addf %182, %108 : vector<16x32xf32>
    %184 = vector.extract_strided_slice %12 {offsets = [8, 0], sizes = [1, 32], strides = [1, 1]} : vector<10x64xf32> to vector<1x32xf32>
    %185 = vector.extract_strided_slice %12 {offsets = [9, 0], sizes = [1, 32], strides = [1, 1]} : vector<10x64xf32> to vector<1x32xf32>
    %cst_61 = arith.constant dense<0.000000e+00> : vector<16xf32>
    %186 = vector.multi_reduction <add>, %183, %cst_61 [1] : vector<16x32xf32> to vector<16xf32>
    %187 = vector.shape_cast %186 : vector<16xf32> to vector<16x1xf32>
    %cst_62 = arith.constant 3.200000e+01 : f32
    %188 = vector.broadcast %cst_62 : f32 to vector<16x1xf32>
    %189 = arith.divf %187, %188 : vector<16x1xf32>
    %190 = vector.broadcast %189 : vector<16x1xf32> to vector<16x32xf32>
    %191 = arith.subf %183, %190 : vector<16x32xf32>
    %192 = arith.mulf %191, %191 : vector<16x32xf32>
    %cst_63 = arith.constant dense<0.000000e+00> : vector<16xf32>
    %193 = vector.multi_reduction <add>, %192, %cst_63 [1] : vector<16x32xf32> to vector<16xf32>
    %194 = vector.shape_cast %193 : vector<16xf32> to vector<16x1xf32>
    %cst_64 = arith.constant 3.200000e+01 : f32
    %195 = vector.broadcast %cst_64 : f32 to vector<16x1xf32>
    %196 = arith.divf %194, %195 : vector<16x1xf32>
    %197 = vector.broadcast %189 : vector<16x1xf32> to vector<16x32xf32>
    %198 = arith.subf %183, %197 : vector<16x32xf32>
    %cst_65 = arith.constant 9.99999974E-6 : f32
    %199 = vector.broadcast %cst_65 : f32 to vector<16x1xf32>
    %200 = arith.addf %196, %199 : vector<16x1xf32>
    %201 = math.rsqrt %200 : vector<16x1xf32>
    %202 = vector.broadcast %201 : vector<16x1xf32> to vector<16x32xf32>
    %203 = arith.mulf %198, %202 : vector<16x32xf32>
    %204 = vector.broadcast %184 : vector<1x32xf32> to vector<16x32xf32>
    %205 = arith.mulf %203, %204 : vector<16x32xf32>
    %206 = vector.broadcast %185 : vector<1x32xf32> to vector<16x32xf32>
    %207 = arith.addf %205, %206 : vector<16x32xf32>
    %208 = vector.broadcast %10 : vector<16x1xf32> to vector<16x32xf32>
    %209 = arith.mulf %207, %208 : vector<16x32xf32>
    %c0_66 = arith.constant 0 : index
    %c0_67 = arith.constant 0 : index
    %c0_68 = arith.constant 0 : index
    %210 = vector.load %arg10[%c0_66, %c0_67, %c0_68] : memref<1x16x32xf32, #tpu.memory_space<vmem>>, vector<1x16x32xf32>
    %211 = vector.shape_cast %210 : vector<1x16x32xf32> to vector<16x32xf32>
    %212 = vector.shape_cast %209 : vector<16x32xf32> to vector<1x16x32xf32>
    tpu.vector_store %arg10[%c0_66, %c0_67, %c0_68], %212 {strides = array<i32>} : memref<1x16x32xf32, #tpu.memory_space<vmem>>, vector<1x16x32xf32>,
    return
  }
  func.func @transform_0(%arg0: i32, %arg1: i32) -> (i32, i32, i32) {
    %c0_i32 = arith.constant 0 : i32
    %c0_i32_0 = arith.constant 0 : i32
    %c0_i32_1 = arith.constant 0 : i32
    return %arg0, %c0_i32, %c0_i32_0 : i32, i32, i32
  }
  func.func @transform_1(%arg0: i32, %arg1: i32) -> (i32, i32, i32) {
    %c0_i32 = arith.constant 0 : i32
    %c0_i32_0 = arith.constant 0 : i32
    %c0_i32_1 = arith.constant 0 : i32
    return %arg0, %c0_i32, %c0_i32_0 : i32, i32, i32
  }
  func.func @transform_2(%arg0: i32, %arg1: i32) -> (i32, i32, i32) {
    %c0_i32 = arith.constant 0 : i32
    %c0_i32_0 = arith.constant 0 : i32
    %c0_i32_1 = arith.constant 0 : i32
    return %arg0, %c0_i32, %c0_i32_0 : i32, i32, i32
  }
  func.func @transform_3(%arg0: i32, %arg1: i32) -> (i32, i32, i32) {
    %c0_i32 = arith.constant 0 : i32
    %c0_i32_0 = arith.constant 0 : i32
    %c0_i32_1 = arith.constant 0 : i32
    return %arg1, %c0_i32, %c0_i32_0 : i32, i32, i32
  }
  func.func @transform_4(%arg0: i32, %arg1: i32) -> (i32, i32, i32) {
    %c0_i32 = arith.constant 0 : i32
    %c0_i32_0 = arith.constant 0 : i32
    %c0_i32_1 = arith.constant 0 : i32
    return %arg1, %c0_i32, %c0_i32_0 : i32, i32, i32
  }
  func.func @transform_5(%arg0: i32, %arg1: i32) -> (i32, i32, i32) {
    %c0_i32 = arith.constant 0 : i32
    %c0_i32_0 = arith.constant 0 : i32
    %c0_i32_1 = arith.constant 0 : i32
    return %arg1, %c0_i32, %c0_i32_0 : i32, i32, i32
  }
  func.func @transform_6(%arg0: i32, %arg1: i32) -> (i32, i32, i32) {
    %c0_i32 = arith.constant 0 : i32
    %c0_i32_0 = arith.constant 0 : i32
    %c0_i32_1 = arith.constant 0 : i32
    return %arg1, %c0_i32, %c0_i32_0 : i32, i32, i32
  }
  func.func @transform_7(%arg0: i32, %arg1: i32) -> (i32, i32, i32) {
    %c0_i32 = arith.constant 0 : i32
    %c0_i32_0 = arith.constant 0 : i32
    %c0_i32_1 = arith.constant 0 : i32
    return %arg1, %c0_i32, %c0_i32_0 : i32, i32, i32
  }
  func.func @transform_8(%arg0: i32, %arg1: i32) -> (i32, i32, i32) {
    %c0_i32 = arith.constant 0 : i32
    %c0_i32_0 = arith.constant 0 : i32
    %c0_i32_1 = arith.constant 0 : i32
    return %arg0, %c0_i32, %c0_i32_0 : i32, i32, i32
  }
}

</mosaic_0001>

<bundles_post_ra>
// kernel: tpu_custom_call.1
= control target key start
LH: loop header
LB: loop body
LE: loop exit
PB: predicated region body
PF: predicated region fallthrough
CT: control target
= control target key end

     0   :  { %s2158_s0 = inlined_call_operand.vmem [shape: f32[2,16,32], index: 0, kind: input, shape index: {}]   ;;  %s2159_s1 = inlined_call_operand.vmem [shape: f32[2,1,16], index: 1, kind: input, shape index: {}]   ;;  %s2160_s2 = inlined_call_operand.vmem [shape: f32[2,16,1], index: 2, kind: input, shape index: {}]   ;;  %s2161_s3 = inlined_call_operand.vmem [shape: bf16[2,32,96], index: 3, kind: input, shape index: {}]   ;;  %s2162_s4 = inlined_call_operand.vmem [shape: bf16[2,32,32], index: 4, kind: input, shape index: {}]   ;;  %s2163_s5 = inlined_call_operand.vmem [shape: bf16[2,96,64], index: 5, kind: input, shape index: {}]   ;;  %s2164_s6 = inlined_call_operand.vmem [shape: bf16[2,192,32], index: 6, kind: input, shape index: {}]   ;;  %s2165_s7 = inlined_call_operand.vmem [shape: f32[2,10,64], index: 7, kind: input, shape index: {}]   ;;  %s2166_s8 = inlined_call_operand.hbm [shape: f32[2,16,32], index: 8, kind: output, shape index: {}]  }
   0x1   :  { %2179 = sst [smem:[#allocation15_spill]] %s2158_s0 }
   0x2   :  { %2180 = sst [smem:[#allocation16_spill]] %s2160_s2 }
   0x3   :  { %2181 = sst [smem:[#allocation17_spill]] %s2166_s8 }
   0x4   :  { %13 = vsyncpa [#allocation3], 0 }
   0x5   :  { %15 = vsyncpa [#allocation3 + $0x1], 0  ;;  %s1811_s27 = smov 0   ;;  %s1813_s28 = smov 0  }
   0x6   :  { %s1815_s29 = smov 0   ;;  %s1817_s30 = smov 0  }
   0x7   :  { %s1819_s9 = smov 0   ;;  %s1821_s10 = smov 0  }
   0x8   :  { %s1823_s11 = smov 0   ;;  %s1825_s12 = smov 0  }
   0x9 LB: > { %2182 = sst [smem:[#allocation5_spill]] %s1727_s27  ;;  %s1368_s13 = sadd.s32 4294967295, %s1755_s12   ;;  %s1755_s12 = sphi %s1825_s12, %s21_s12   ;;  %s1751_s11 = sphi %s1823_s11, %s2210_s11   ;;  %s1747_s10 = sphi %s1821_s10, %s2209_s10   ;;  %s1743_s9 = sphi %s1819_s9, %s2208_s9   ;;  %s1739_s30 = sphi %s1817_s30, %s2207_s30   ;;  %s1735_s29 = sphi %s1815_s29, %s2206_s29   ;;  %s1731_s28 = sphi %s1813_s28, %s2212_s28   ;;  %s1727_s27 = sphi %s1811_s27, %s2211_s27  }
   0xa   : > { %2183 = sst [smem:[#allocation6_spill]] %s1735_s29  ;;  %s1369_s14 = sadd.s32 4294967294, %s1755_s12  }
   0xb   : > { %2184 = sst [smem:[#allocation7_spill]] %s1747_s10  ;;  %s30_s15 = sadd.s32 1, %s1747_s10 }
   0xc   : > { %2185 = sst [smem:[#allocation8_spill]] %s1751_s11  ;;  %p31_p0 = scmp.ge.s32.totalorder %s30_s15, 2 }
   0xd   : > { %2186 = sst [smem:[#allocation9_spill]] %s1755_s12  ;;  %s33_s16 = sadd.s32 1, %s1751_s11 }
   0xe   : > { %p258_p1 = scmp.ne.s32.totalorder %s1735_s29, %s1731_s28  ;;  %p259_p2 = scmp.eq.s32.totalorder %s1368_s13, 3 }
   0xf   : > { %s2214_s15 = smov (%p31_p0, %s30_s15), 0  ;;  %s2216_s16 = smov (!%p31_p0, %s33_s16), %s1751_s11 }
  0x10   : > { %2187 = sst [smem:[#allocation10_spill]] %s2214_s15  ;;  %p1860_p3 = por %p259_p2, %p258_p1 }
  0x11   : > { %p264_p4 = scmp.ne.s32.totalorder %s1731_s28, %s1727_s27  ;;  %p35_p5 = scmp.ge.s32.totalorder %s2216_s16, 2 }
  0x12   : > { %s2188_s17 = scalar_select %p1860_p3, 1, 0 }
  0x13   : > { %p265_p6 = scmp.eq.s32.totalorder %s1369_s14, 3  ;;  %p1372_p7 = scmp.ge.s32.totalorder %s1755_s12, 1 }
  0x14   : > { %2189 = sst [smem:[#allocation11_spill]] %s2188_s17  ;;  %p345_p8 = scmp.lt.s32.totalorder %s1755_s12, 5 }
  0x15   : > { %s2218_s16 = smov (%p35_p5, %s2216_s16), 0  ;;  %p1870_p9 = por %p265_p6, %p264_p4 }
  0x16   : > { %2190 = sst [smem:[#allocation12_spill]] %s2218_s16  ;;  %p346_p10 = pnand %p1372_p7, %p345_p8 }
  0x17   : > { %s2191_s18 = scalar_select %p1870_p9, 1, 0 }
  0x18   : > { %s245_s19 = ssub.s32 %s1751_s11, %s2218_s16  ;;  %s248_s20 = sadd.s32 1, %s1735_s29 }
  0x19   : > { %2192 = sst [smem:[#allocation13_spill]] %s2191_s18  ;;  %p246_p11 = scmp.eq.s32.totalorder %s245_s19, 0 }
  0x1a   : > { %349 = sbr.rel (%p346_p10) target bundleno = 2296 (0x8f8), region = 52  ;;  %s2170_s22 = sand.u32 (!%p346_p10), 1, %s1731_s28  }
  0x1b   : > { %s1878_s21 = scalar_select %p246_p11, %s1735_s29, %s248_s20  }
  0x1c   : > { %p412_p12 = scmp.lt.s32.totalorder (!%p346_p10), %s1743_s9, 1  ;;  %s1373_s23 = sshll.u32 (!%p346_p10), %s2170_s22, 4 }
  0x1d   : > { %2193 = sst [smem:[#allocation14_spill]] %s1878_s21  ;;  %p425_p13 = scmp.lt.s32.totalorder (!%p346_p10), %s1739_s30, 1 }
  0x1e   : > { %s2194_s0 = sld [smem:[#allocation15_spill]] (!%p346_p10)  ;;  %s1925_s18 = scalar_lea.vmem (!%p346_p10), [#allocation2], %s1373_s23 }
  0x1f   : > { %s1886_s24 = scalar_select %p412_p12, %s1743_s9, 1 }
  0x20   : > { %s426_s25 = scalar_select %p425_p13, %s1739_s30, 1 }
  0x21   : > { %s1488_s26 = sshll.u32 %s1886_s24, 4  ;;  %s2195_s2 = sld [smem:[#allocation16_spill]] }
  0x22   : > { %s1490_s22 = sshll.u32 %s426_s25, 4  ;;  %s1516_s29 = smul.u32 48, %s426_s25 }
  0x23   : > { %s429_s12 = scalar_lea.vmem %s2161_s3, %s1490_s22  ;;  %s1908_s13 = scalar_lea.vmem %s2162_s4, %s1490_s22 }
  0x24   : > { %s416_s15 = scalar_lea.vmem %s2194_s0, %s1488_s26  ;;  %s1913_s16 = scalar_lea.vmem %s2163_s5, %s1516_s29 }
  0x25   : > { %s1517_s20 = smul.u32 96, %s426_s25  ;;  %p1386_p0 = scmp.ne.s32.totalorder %s1739_s30, 0 }
  0x27   : > { %s1900_s21 = scalar_lea.vmem %s2195_s2, %s1488_s26  ;;  %s1918_s26 = scalar_lea.vmem %s2165_s7, %s1490_s22 }
  0x28   : > { %s1923_s27 = scalar_lea.vmem %s2164_s6, %s1517_s20  ;;  %454 = sbr.rel (%p1386_p0) target bundleno = 48 (0x30), region = 56 }
  0x2d   : > { %v455_v0 = vld [vmem:[%s416_s15] sm:$0xff]  ;;  %vm457_vm0 = vcmask 261120   ;;  %v456_v1 = vld [vmem:[%s416_s15 + $0x8] sm:$0xff] }
  0x2e   : > { %458 = vst.msk [vmem:[%s1925_s18] sm:$0xff] %vm457_vm0, %v455_v0 }
  0x2f   : > { %459 = vst.msk [vmem:[%s1925_s18 + $0x8] sm:$0xff] %vm457_vm0, %v456_v1 }
  0x30 PF: > { %v1494_v2 = vld [vmem:[%s429_s12 + $0x8] sm:$0xff]  ;;  %v1931_v3 = vld [vmem:[%s1918_s26] sm:$0xff]  ;;  %s1757_s0 = smov 32   ;;  %vm489_vm1 = vcmask 261120   ;;  %s1758_s2 = smov 112   ;;  %vm568_vm2 = vcmask 130048  }
  0x31   : > { %499 = vmatpush.bf16.msra.mxu0 %v1494_v2  ;;  %v1493_v4 = vld [vmem:[%s429_s12] sm:$0xff]  ;;  %v510_v7 = vperm.slane %v1931_v3, 1  ;;  %v507_v10 = vperm.slane %v1931_v3, 0  ;;  %s1759_s8 = smov 96   ;;  %v517_v29 = vperm.slane %v1931_v3, 2  ;;  %s1760_s29 = smov 64  }
  0x32   : > { %v1761_v49 = vmov 0   ;;  %s2196_s15 = scalar_lea.vmem %s2159_s1, %s1886_s24  ;;  %s1762_s17 = smov 16   ;;  %vm929_vm0 = vcmask 523264  }
  0x33   : > { %512 = vrot.lane.b32.xlu0 %v510_v7, %s1757_s0  ;;  %1619 = vset.pattern.permute.xlu1 %v1761_v49  ;;  %v462_v56 = vld [vmem:[%s2196_s15] sm:$0x1]  ;;  %s2199_s24 = sld [smem:[#allocation17_spill]] }
  0x34   : > { %1618 = vset.pattern.permute.xlu0 %v1761_v49  ;;  %vm625_vm3 = vcmp.gt.f32.partialorder %v462_v56, 0.5 }
  0x35   : > { %v1934_v5 = vld [vmem:[%s1925_s18] sm:$0xff]  ;;  %500 = vmatpush.bf16.msra.mxu0 %v1493_v4  ;;  %v626_v60 = vsel %vm625_vm3, 1, %v1761_v49 }
  0x36   : > { %v1937_v6 = vld [vmem:[%s1925_s18 + $0x8] sm:$0xff]  ;;  %v627_v61 = vperm.slane %v626_v60, 0 }
  0x37   : > { %v472_v8 = vpack.c.bf16 %v1937_v6, %v1934_v5 }
  0x38   : > { %vm1964_vm4 = vcmp.eq.s32.totalorder %v627_v61, 1 }
  0x39   : > { %1395 = vmatmul.msk.bf16.vlgmr.msra.gmra.mxu0 %vm489_vm1, %v472_v8 }
  0xa5   : > { %v513_v11 = vpop.permute.xlu0 %512 }
  0xb6   : > { %v502_v9 = vpop.f32.mrf.mxu0 }
  0xb7   : > { %v515_v12 = vadd.f32 %v513_v11, %v502_v9  ;;  %v508_v13 = vadd.f32 %v507_v10, %v502_v9 }
  0xb9   : > { %v548_v17 = vpack.c.bf16 %v508_v13, %v508_v13  ;;  %v552_v18 = vpack.c.bf16 %v515_v12, %v515_v12 }
  0xbb   : > { %v563_v23 = vunpack.c.l.b16 %v552_v18  ;;  %v558_v25 = vunpack.c.l.b16 %v548_v17 }
  0xbe   : > { %v504_v14 = vpop.f32.mrf.mxu0 }
  0xbf   : > { %v516_v15 = vadd.f32 %v513_v11, %v504_v14  ;;  %v509_v16 = vadd.f32 %v507_v10, %v504_v14 }
  0xc1   : > { %v1598_v19 = vpack.i.bf16 %v516_v15, %v515_v12  ;;  %v1603_v20 = vpack.i.bf16 %v509_v16, %v508_v13  ;;  %v549_v21 = vpack.c.bf16 %v509_v16, %v509_v16  ;;  %v553_v22 = vpack.c.bf16 %v516_v15, %v516_v15 }
  0xc3   : > { %1599 = vrot.lane.b32.xlu0 %v1598_v19, %s1758_s2  ;;  %1604 = vrot.lane.b32.xlu2 %v1603_v20, %s1758_s2  ;;  %v564_v24 = vunpack.c.l.b16 %v553_v22  ;;  %v559_v26 = vunpack.c.l.b16 %v549_v21 }
  0xc5   : > { %v565_v27 = vpack.c.b16 %v564_v24, %v563_v23  ;;  %v560_v28 = vpack.c.b16 %v559_v26, %v558_v25 }
  0xc7   : > { %566 = vrot.lane.b32.xlu1 %v565_v27, %s1759_s8 }
  0xcb   : > { %519 = vrot.lane.b32.xlu2 %v517_v29, %s1760_s29 }
 0x11d   : > { %v1605_v30 = vpop.permute.xlu2 %1604 }
 0x11e   : > { %v1607_v50 = vunpack.i.h.bf16 %v1605_v30  ;;  %v1606_v51 = vunpack.i.l.bf16 %v1605_v30 }
 0x120   : > { %v551_v52 = vpack.c.bf16 %v1607_v50, %v1607_v50  ;;  %v550_v53 = vpack.c.bf16 %v1606_v51, %v1606_v51 }
 0x122   : > { %v592_v57 = vunpack.c.l.b16 %v551_v52  ;;  %v591_v58 = vunpack.c.l.b16 %v550_v53 }
 0x124   : > { %v593_v59 = vpack.c.b16 %v592_v57, %v591_v58 }
 0x125   : > { %v520_v31 = vpop.permute.xlu2 %519 }
 0x126   : > { %v522_v32 = vadd.f32 %v520_v31, %v502_v9  ;;  %v523_v33 = vadd.f32 %v520_v31, %v504_v14 }
 0x128   : > { %v682_v34 = vpack.c.bf16 %v523_v33, %v523_v33  ;;  %v681_v35 = vpack.c.bf16 %v522_v32, %v522_v32  ;;  %v1608_v10 = vpack.i.bf16 %v523_v33, %v522_v32 }
 0x12a   : > { %v1949_v36 = vunpack.c.l.b16 %v682_v34  ;;  %v1951_v37 = vunpack.c.l.b16 %v681_v35 }
 0x12c   : > { %v694_v38 = vpack.c.b16 %v1949_v36, %v1951_v37 }
 0x135   : > { %v1600_v39 = vpop.permute.xlu0 %1599 }
 0x136   : > { %v1602_v40 = vunpack.i.h.bf16 %v1600_v39  ;;  %v1601_v41 = vunpack.i.l.bf16 %v1600_v39 }
 0x138   : > { %v555_v42 = vpack.c.bf16 %v1602_v40, %v1602_v40  ;;  %v554_v43 = vpack.c.bf16 %v1601_v41, %v1601_v41 }
 0x139   : > { %v567_v44 = vpop.permute.xlu1 %566 }
 0x13a   : > { %v597_v45 = vunpack.c.l.b16 %v555_v42  ;;  %v596_v46 = vunpack.c.l.b16 %v554_v43  ;;  %v573_v47 = vsel %vm568_vm2, %v567_v44, 0 }
 0x13b   : > { %582 = vmatpush.bf16.xpose.msra.mxu1 %v573_v47 }
 0x13c   : > { %v598_v48 = vpack.c.b16 %v597_v45, %v596_v46 }
 0x13e   : > { %599 = vrot.lane.b32.xlu1 %v598_v48, %s1759_s8 }
 0x142   : > { %1396 = vmatmul.msk.bf16.vlgmr.msra.gmra.mxu1 %vm568_vm2, %v560_v28 }
 0x1b0   : > { %v600_v54 = vpop.permute.xlu1 %599 }
 0x1b1   : > { %v605_v55 = vsel %vm568_vm2, %v600_v54, 0 }
 0x1b2   : > { %614 = vmatpush.bf16.xpose.msra.mxu2 %v605_v55 }
 0x1b9   : > { %1397 = vmatmul.msk.bf16.vlgmr.msra.gmra.mxu2 %vm568_vm2, %v593_v59 }
 0x1bf   : > { %v584_v62 = vpop.f32.mrf.mxu1 }
 0x1c0   : > { %v621_v0 = vmul.f32 0.25, %v584_v62 }
 0x1c2   : > { %v629_v1 = vsel %vm1964_vm4, -1e+30, %v621_v0 }
 0x1c3   : > { %v633_v2 = vsel %vm568_vm2, %v629_v1, -inf }
 0x1c4   : > { %634 = vmax.xlane.f32.xlu0 %v633_v2 }
 0x1c7   : > { %v586_v4 = vpop.f32.mrf.mxu1 }
 0x1c8   : > { %v622_v7 = vmul.f32 0.25, %v586_v4 }
 0x1ca   : > { %v630_v8 = vsel %vm1964_vm4, -1e+30, %v622_v7 }
 0x1cb   : > { %v636_v9 = vsel %vm568_vm2, %v630_v8, -inf }
 0x1cc   : > { %637 = vmax.xlane.f32.xlu1 %v636_v9 }
 0x1d8   : > { %1609 = vrot.lane.b32.xlu0 %v1608_v10, %s1758_s2  ;;  %v1496_v10 = vld [vmem:[%s1908_s13 + $0x8] sm:$0xff] }
 0x1d9   : > { %782 = vmatpush.bf16.msrb.mxu0 %v1496_v10 }
 0x237   : > { %v635_v11 = vpop.xlane.xlu0 %634 }
 0x238   : > { %v645_v12 = vsub.f32 %v629_v1, %v635_v11  ;;  %v1495_v11 = vld [vmem:[%s1908_s13] sm:$0xff]  ;;  %s1211_s13 = sshll.u32 %s1925_s18, 4  ;;  %s1212_s13 = int_to_ptr.vmem [resolvable:$true] %s1211_s13 }
 0x239   : > { %783 = vmatpush.bf16.msrb.mxu0 %v1495_v11 }
 0x23a   : > { %v649_v13 = vmul.f32 1.442695, %v645_v12 }
 0x23c   : > { %1635 = vpow2.f32 %v649_v13  ;;  %v616_v14 = vpop.f32.mrf.mxu2 }
 0x23d   : > { %v623_v15 = vmul.f32 0.25, %v616_v14 }
 0x23f   : > { %v638_v16 = vpop.xlane.xlu1 %637  ;;  %v631_v17 = vsel %vm1964_vm4, -1e+30, %v623_v15 }
 0x240   : > { %v646_v18 = vsub.f32 %v630_v8, %v638_v16  ;;  %v639_v19 = vsel %vm568_vm2, %v631_v17, -inf }
 0x241   : > { %640 = vmax.xlane.f32.xlu2 %v639_v19 }
 0x242   : > { %v1636_v20 = vpop.eup %1635  ;;  %v651_v21 = vmul.f32 1.442695, %v646_v18 }
 0x243   : > { %v657_v22 = vsel %vm568_vm2, %v1636_v20, 0.0 }
 0x244   : > { %v618_v23 = vpop.f32.mrf.mxu2  ;;  %658 = vadd.xlane.f32.xlu1 %v657_v22  ;;  %1637 = vpow2.f32 %v651_v21 }
 0x245   : > { %v624_v24 = vmul.f32 0.25, %v618_v23  ;;  %v760_v23 = vperm.slane %v1931_v3, 3 }
 0x247   : > { %v632_v25 = vsel %vm1964_vm4, -1e+30, %v624_v24 }
 0x248   : > { %v642_v26 = vsel %vm568_vm2, %v632_v25, -inf }
 0x249   : > { %643 = vmax.xlane.f32.xlu2 %v642_v26 }
 0x24a   : > { %v1638_v27 = vpop.eup %1637  ;;  %v1610_v36 = vpop.permute.xlu0 %1609 }
 0x24b   : > { %v660_v28 = vsel %vm568_vm2, %v1638_v27, 0.0  ;;  %v1612_v45 = vunpack.i.h.bf16 %v1610_v36  ;;  %v1611_v46 = vunpack.i.l.bf16 %v1610_v36  ;;  %v464_v36 = vld [vmem:[%s1900_s21 + $0x8] sm:$0xff] }
 0x24d   : > { %v684_v50 = vpack.c.bf16 %v1612_v45, %v1612_v45  ;;  %v683_v51 = vpack.c.bf16 %v1611_v46, %v1611_v46 }
 0x24f   : > { %v723_v56 = vunpack.c.l.b16 %v684_v50  ;;  %v722_v57 = vunpack.c.l.b16 %v683_v51 }
 0x251   : > { %661 = vadd.xlane.f32.xlu2 %v660_v28  ;;  %v724_v58 = vpack.c.b16 %v723_v56, %v722_v57 }
 0x25d   : > { %695 = vrot.lane.b32.xlu1 %v694_v38, %s1760_s29 }
 0x2b4   : > { %v641_v29 = vpop.xlane.xlu2 %640 }
 0x2b5   : > { %v647_v30 = vsub.f32 %v631_v17, %v641_v29 }
 0x2b7   : > { %v653_v31 = vmul.f32 1.442695, %v647_v30  ;;  %v659_v32 = vpop.xlane.xlu1 %658 }
 0x2b9   : > { %1639 = vpow2.f32 %v653_v31 }
 0x2ba   : > { %1641 = vrcp.f32 %v659_v32  ;;  %v1763_v32 = vmov 32.0  }
 0x2bc   : > { %v644_v33 = vpop.xlane.xlu2 %643 }
 0x2bd   : > { %v648_v34 = vsub.f32 %v632_v25, %v644_v33 }
 0x2bf   : > { %v1640_v35 = vpop.eup %1639  ;;  %v655_v39 = vmul.f32 1.442695, %v648_v34 }
 0x2c0   : > { %v663_v40 = vsel %vm568_vm2, %v1640_v35, 0.0  ;;  %v1642_v42 = vpop.eup %1641 }
 0x2c1   : > { %1643 = vpow2.f32 %v655_v39  ;;  %664 = vadd.xlane.f32.xlu2 %v663_v40  ;;  %v673_v38 = vmul.f32 %v1642_v42, %v1636_v20 }
 0x2c3   : > { %v677_v48 = vpack.c.bf16 %v673_v38, %v673_v38 }
 0x2c4   : > { %v662_v41 = vpop.xlane.xlu2 %661 }
 0x2c5   : > { %1645 = vrcp.f32 %v662_v41  ;;  %v687_v53 = vunpack.c.l.b16 %v677_v48 }
 0x2c7   : > { %v1644_v43 = vpop.eup %1643 }
 0x2c8   : > { %v666_v37 = vsel %vm568_vm2, %v1644_v43, 0.0 }
 0x2c9   : > { %667 = vadd.xlane.f32.xlu0 %v666_v37  ;;  %v466_v37 = vsub.f32 1.0, %v464_v36 }
 0x2cb   : > { %v1646_v44 = vpop.eup %1645 }
 0x2cc   : > { %v674_v47 = vmul.f32 %v1646_v44, %v1638_v27 }
 0x2ce   : > { %v678_v49 = vpack.c.bf16 %v674_v47, %v674_v47 }
 0x2cf   : > { %v696_v52 = vpop.permute.xlu1 %695 }
 0x2d0   : > { %708 = vmatpush.bf16.msra.mxu3 %v696_v52  ;;  %v688_v54 = vunpack.c.l.b16 %v678_v49  ;;  %v463_v49 = vld [vmem:[%s1900_s21] sm:$0xff]  ;;  %s1515_s21 = sshll.u32 %s1743_s9, 4  ;;  %s2201_s9 = sand.u32 1, %s1731_s28  }
 0x2d1   : > { %v465_v50 = vsub.f32 1.0, %v463_v49  ;;  %s1210_s25 = scalar_lea.hbm %s2199_s24, %s1515_s21 }
 0x2d2   : > { %v689_v55 = vpack.c.b16 %v688_v54, %v687_v53  ;;  %s1213_s14 = sshll.u32 %s1210_s25, 4  ;;  %s1214_s14 = int_to_ptr.hbm [resolvable:$true] %s1213_s14 }
 0x2d3   : > { %s1675_s20 = sshra.s32 %s1214_s14, 4  ;;  %s1676_s20 = int_to_ptr.hbm [resolvable:$true] %s1675_s20 }
 0x2d4   : > { %1398 = vmatmul.msk.bf16.vlgmr.msra.gmra.mxu3 %vm568_vm2, %v689_v55  ;;  %s1677_s10 = scalar_lea.hbm %s1676_s20, 16  ;;  %p1682_p5 = scmp.lt.s32.totalorder %s1676_s20, %s2199_s24 }
 0x2d5   : > { %p1678_p1 = scmp.ne.s32.totalorder %s1676_s20, %s1677_s10 }
 0x2d7   : > { %p1679_p2 = pnand %p1678_p1, %p1860_p3 }
 0x2d9   : > { %725 = vrot.lane.b32.xlu2 %v724_v58, %s1760_s29  ;;  %p1680_p4 = pneg %p1679_p2 }
 0x334   : > { %v665_v59 = vpop.xlane.xlu2 %664 }
 0x335   : > { %1647 = vrcp.f32 %v665_v59 }
 0x33b   : > { %v1648_v62 = vpop.eup %1647 }
 0x33c   : > { %v668_v60 = vpop.xlane.xlu0 %667  ;;  %v726_v61 = vpop.permute.xlu2 %725  ;;  %v675_v63 = vmul.f32 %v1648_v62, %v1640_v35 }
 0x33d   : > { %1649 = vrcp.f32 %v668_v60  ;;  %738 = vmatpush.bf16.msrb.mxu3 %v726_v61 }
 0x33e   : > { %v679_v1 = vpack.c.bf16 %v675_v63, %v675_v63  ;;  %1651 = vrcp.f32 %v1763_v32 }
 0x340   : > { %v717_v7 = vunpack.c.l.b16 %v679_v1 }
 0x343   : > { %v1650_v0 = vpop.eup %1649 }
 0x344   : > { %v676_v2 = vmul.f32 %v1650_v0, %v1644_v43  ;;  %v1652_v33 = vpop.eup %1651 }
 0x345   : > { %v799_v34 = vmul.f32 32.0, %v1652_v33  ;;  %vm803_vm5 = vweird.f32 %v1652_v33 }
 0x346   : > { %v680_v4 = vpack.c.bf16 %v676_v2, %v676_v2 }
 0x347   : > { %v800_v35 = vsub.f32 1.0, %v799_v34  ;;  %v1501_v34 = vld [vmem:[%s1913_s16 + $0x20] sm:$0xff] }
 0x348   : > { %v718_v8 = vunpack.c.l.b16 %v680_v4 }
 0x349   : > { %v801_v39 = vmul.f32 %v1652_v33, %v800_v35  ;;  %v1500_v35 = vld [vmem:[%s1913_s16 + $0x18] sm:$0xff] }
 0x34a   : > { %v719_v9 = vpack.c.b16 %v718_v8, %v717_v7  ;;  %v843_v7 = vperm.slane %v1931_v3, 4  ;;  %v469_v8 = vlaneseq }
 0x34b   : > { %v802_v40 = vadd.f32 %v1652_v33, %v801_v39  ;;  %v1499_v39 = vld [vmem:[%s1913_s16 + $0x10] sm:$0xff] }
 0x34c   : > { %1399 = vmatmul.msk.bf16.vlgmr.msrb.gmra.mxu3 %vm568_vm2, %v719_v9 }
 0x357   : > { %v710_v12 = vpop.f32.mrf.mxu3 }
 0x35f   : > { %v712_v13 = vpop.f32.mrf.mxu3 }
 0x3cf   : > { %v740_v14 = vpop.f32.mrf.mxu3 }
 0x3d7   : > { %v742_v15 = vpop.f32.mrf.mxu3 }
 0x3d8   : > { %v1613_v16 = vpack.i.bf16 %v742_v15, %v740_v14 }
 0x3da   : > { %1614 = vrot.lane.b32.xlu1 %v1613_v16, %s1762_s17 }
 0x44c   : > { %v1615_v17 = vpop.permute.xlu1 %1614 }
 0x44d   : > { %v1617_v18 = vunpack.i.h.bf16 %v1615_v17  ;;  %v1616_v19 = vunpack.i.l.bf16 %v1615_v17 }
 0x44f   : > { %v754_v20 = vsel %vm568_vm2, %v712_v13, %v1617_v18  ;;  %v753_v21 = vsel %vm568_vm2, %v710_v12, %v1616_v19  ;;  %v846_v12 = vperm.slane %v1931_v3, 5  ;;  %v2014_v13 = vshrl.u32 %v469_v8, 7 }
 0x450   : > { %v755_v22 = vpack.c.bf16 %v754_v20, %v753_v21  ;;  %vm970_vm2 = vcmask 785408  }
 0x451   : > { %v471_v18 = vadd.s32 8, %v2014_v13  ;;  %vm894_vm12 = vcmp.lt.s32.totalorder %v2014_v13, 7  ;;  %vm875_vm14 = vcmp.lt.s32.totalorder %v2014_v13, 1 }
 0x452   : > { %1408 = vmatmul.msk.bf16.vlgmr.msrb.gmra.mxu0 %vm489_vm1, %v755_v22 }
 0x4cf   : > { %v785_v24 = vpop.f32.mrf.mxu0 }
 0x4d0   : > { %v786_v25 = vadd.f32 %v785_v24, %v760_v23  ;;  %v2024_v24 = vadd.s32 1, %v471_v18 }
 0x4d2   : > { %v790_v26 = vadd.f32 %v786_v25, %v1934_v5  ;;  %v2002_v5 = vsel %vm803_vm5, %v1652_v33, %v802_v40  ;;  %vm902_vm13 = vcmp.lt.s32.totalorder %v2024_v24, 16  ;;  %v1502_v33 = vld [vmem:[%s1913_s16 + $0x28] sm:$0xff]  ;;  %v1038_v24 = vperm.slane %v1931_v3, 7 }
 0x4d3   : > { %976 = vmatpush.bf16.msrb.mxu1 %v1502_v33  ;;  %v1498_v40 = vld [vmem:[%s1913_s16 + $0x8] sm:$0xff] }
 0x4d4   : > { %v792_v27 = vsel %vm489_vm1, %v790_v26, 0.0 }
 0x4d5   : > { %793 = vadd.xlane.f32.xlu1 %v792_v27 }
 0x4d7   : > { %v787_v28 = vpop.f32.mrf.mxu0  ;;  %977 = vmatpush.bf16.msrb.mxu1 %v1501_v34 }
 0x4d8   : > { %v788_v29 = vadd.f32 %v787_v28, %v760_v23 }
 0x4da   : > { %v791_v30 = vadd.f32 %v788_v29, %v1937_v6 }
 0x4db   : > { %978 = vmatpush.bf16.msrb.mxu1 %v1500_v35 }
 0x4dc   : > { %v795_v31 = vsel %vm489_vm1, %v791_v30, 0.0 }
 0x4dd   : > { %796 = vadd.xlane.f32.xlu2 %v795_v31 }
 0x4df   : > { %979 = vmatpush.bf16.msrb.mxu1 %v1499_v39 }
 0x4e3   : > { %980 = vmatpush.bf16.msrb.mxu1 %v1498_v40 }
 0x4ee   : > { %856 = vperm.xlu1 %1619, %v466_v37  }
 0x548   : > { %v794_v41 = vpop.xlane.xlu1 %793 }
 0x549   : > { %v805_v42 = vmul.f32 %v2002_v5, %v794_v41  ;;  %v1497_v41 = vld [vmem:[%s1913_s16] sm:$0xff]  ;;  %s1199_s16 = scalar_lea.sflag [#allocation3], %s2201_s9 }
 0x54a   : > { %981 = vmatpush.bf16.msrb.mxu1 %v1497_v41 }
 0x54b   : > { %v807_v43 = vsub.f32 %v790_v26, %v805_v42 }
 0x54d   : > { %v809_v6 = vmul.f32 %v807_v43, %v807_v43 }
 0x54f   : > { %v811_v38 = vsel %vm489_vm1, %v809_v6, 0.0 }
 0x550   : > { %v797_v44 = vpop.xlane.xlu2 %796  ;;  %812 = vadd.xlane.f32.xlu0 %v811_v38 }
 0x551   : > { %v806_v45 = vmul.f32 %v2002_v5, %v797_v44 }
 0x553   : > { %v808_v46 = vsub.f32 %v791_v30, %v806_v45 }
 0x555   : > { %v810_v47 = vmul.f32 %v808_v46, %v808_v46 }
 0x557   : > { %v814_v48 = vsel %vm489_vm1, %v810_v47, 0.0 }
 0x558   : > { %815 = vadd.xlane.f32.xlu0 %v814_v48 }
 0x560   : > { %v2019_v21 = vpop.permute.xlu1 %856 }
 0x56c   : > { %851 = vperm.xlu0 %1618, %v465_v50  }
 0x5c3   : > { %v813_v51 = vpop.xlane.xlu0 %812 }
 0x5c4   : > { %v817_v52 = vmul.f32 %v813_v51, %v2002_v5 }
 0x5c6   : > { %v819_v53 = vadd.f32 1e-05, %v817_v52 }
 0x5c8   : > { %1653 = vrsqrt.f32 %v819_v53  ;;  %vm827_vm7 = vweird.f32 %v819_v53 }
 0x5cb   : > { %v816_v54 = vpop.xlane.xlu0 %815 }
 0x5cc   : > { %v818_v55 = vmul.f32 %v816_v54, %v2002_v5 }
 0x5ce   : > { %v1654_v56 = vpop.eup %1653  ;;  %v820_v57 = vadd.f32 1e-05, %v818_v55  ;;  %v1514_v55 = vld [vmem:[%s1923_s27 + $0x58] sm:$0xff] }
 0x5cf   : > { %v822_v58 = vmul.f32 %v1654_v56, %v819_v53  ;;  %vm828_vm6 = vweird.f32 %v1654_v56  ;;  %1132 = vmatpush.bf16.msra.mxu3 %v1514_v55 }
 0x5d0   : > { %1655 = vrsqrt.f32 %v820_v57  ;;  %vm829_vm8 = vmor %vm827_vm7, %vm828_vm6  ;;  %vm837_vm10 = vweird.f32 %v820_v57 }
 0x5d1   : > { %v823_v59 = vmul.f32 %v1654_v56, %v822_v58  ;;  %v1511_v58 = vld [vmem:[%s1923_s27 + $0x40] sm:$0xff] }
 0x5d3   : > { %v824_v60 = vmul.f32 0.5, %v823_v59  ;;  %v1510_v59 = vld [vmem:[%s1923_s27 + $0x38] sm:$0xff] }
 0x5d4   : > { %1114 = vmatpush.bf16.msrb.mxu2 %v1510_v59 }
 0x5d5   : > { %v825_v61 = vsub.f32 1.5, %v824_v60  ;;  %v1509_v60 = vld [vmem:[%s1923_s27 + $0x30] sm:$0xff] }
 0x5d6   : > { %v1656_v62 = vpop.eup %1655 }
 0x5d7   : > { %v826_v63 = vmul.f32 %v1654_v56, %v825_v61  ;;  %v832_v0 = vmul.f32 %v1656_v62, %v820_v57  ;;  %vm838_vm9 = vweird.f32 %v1656_v62  ;;  %v1512_v57 = vld [vmem:[%s1923_s27 + $0x48] sm:$0xff] }
 0x5d8   : > { %vm839_vm11 = vmor %vm837_vm10, %vm838_vm9  ;;  %1115 = vmatpush.bf16.msrb.mxu2 %v1509_v60  ;;  %v1508_v61 = vld [vmem:[%s1923_s27 + $0x28] sm:$0xff] }
 0x5d9   : > { %v833_v1 = vmul.f32 %v1656_v62, %v832_v0  ;;  %v830_v2 = vsel %vm829_vm8, %v1654_v56, %v826_v63  ;;  %v1513_v56 = vld [vmem:[%s1923_s27 + $0x50] sm:$0xff]  ;;  %v933_v63 = vperm.slane %v1931_v3, 6 }
 0x5da   : > { %v841_v4 = vmul.f32 %v830_v2, %v807_v43  ;;  %v2051_v43 = vadd.s32 4294967295, %v2014_v13  ;;  %1133 = vmatpush.bf16.msra.mxu3 %v1513_v56 }
 0x5db   : > { %v834_v9 = vmul.f32 0.5, %v833_v1  ;;  %v1506_v1 = vld [vmem:[%s1923_s27 + $0x18] sm:$0xff] }
 0x5dc   : > { %v844_v11 = vmul.f32 %v843_v7, %v841_v4  ;;  %vm880_vm15 = vcmp.ge.s32.totalorder %v2051_v43, 0  ;;  %1116 = vmatpush.bf16.msrb.mxu2 %v1508_v61  ;;  %v1505_v4 = vld [vmem:[%s1923_s27 + $0x10] sm:$0xff] }
 0x5dd   : > { %v835_v10 = vsub.f32 1.5, %v834_v9 }
 0x5de   : > { %v847_v16 = vadd.f32 %v846_v12, %v844_v11  ;;  %v2017_v19 = vpop.permute.xlu0 %851  ;;  %1134 = vmatpush.bf16.msra.mxu3 %v1512_v57 }
 0x5df   : > { %v836_v14 = vmul.f32 %v1656_v62, %v835_v10  ;;  %v1504_v10 = vld [vmem:[%s1923_s27 + $0x8] sm:$0xff] }
 0x5e0   : > { %v2022_v22 = vmul.f32 %v2017_v19, %v847_v16 }
 0x5e1   : > { %v840_v15 = vsel %vm839_vm11, %v1656_v62, %v836_v14  ;;  %v1507_v62 = vld [vmem:[%s1923_s27 + $0x20] sm:$0xff] }
 0x5e2   : > { %v842_v17 = vmul.f32 %v840_v15, %v808_v46  ;;  %v892_v27 = vrot.slane %v2022_v22, 1  ;;  %v873_v6 = vrot.slane %v2022_v22, 7  ;;  %1135 = vmatpush.bf16.msra.mxu3 %v1511_v58  ;;  %1117 = vmatpush.bf16.msrb.mxu2 %v1507_v62 }
 0x5e4   : > { %v845_v20 = vmul.f32 %v843_v7, %v842_v17 }
 0x5e6   : > { %v848_v23 = vadd.f32 %v846_v12, %v845_v20  ;;  %1118 = vmatpush.bf16.msrb.mxu2 %v1506_v1 }
 0x5e8   : > { %v2027_v25 = vmul.f32 %v2019_v21, %v848_v23 }
 0x5ea   : > { %v1620_v26 = vpack.i.bf16 %v2027_v25, %v2022_v22  ;;  %v893_v28 = vrot.slane %v2027_v25, 1  ;;  %v874_v42 = vrot.slane %v2027_v25, 7  ;;  %1119 = vmatpush.bf16.msrb.mxu2 %v1505_v4 }
 0x5ec   : > { %1621 = vrot.lane.b32.xlu2 %v1620_v26, %s1757_s0  ;;  %v895_v29 = vsel %vm894_vm12, %v892_v27, %v893_v28  ;;  %v896_v30 = vsel %vm894_vm12, %v893_v28, %v892_v27  ;;  %v877_v44 = vsel %vm875_vm14, %v874_v42, %v873_v6  ;;  %v876_v46 = vsel %vm875_vm14, %v873_v6, %v874_v42 }
 0x5ed   : > { %v910_v31 = vsel %vm902_vm13, %v896_v30, 0.0  ;;  %v890_v47 = vsel %vm880_vm15, %v877_v44, 0.0 }
 0x5ee   : > { %v1625_v32 = vpack.i.bf16 %v910_v31, %v895_v29  ;;  %1120 = vmatpush.bf16.msrb.mxu2 %v1504_v10  ;;  %v1503_v29 = vld [vmem:[%s1923_s27] sm:$0xff]  ;;  %s1681_s27 = scalar_lea.hbm %s2199_s24, 32 }
 0x5ef   : > { %p1683_p6 = scmp.lt.s32.totalorder %s1681_s27, %s1677_s10 }
 0x5f0   : > { %1626 = vrot.lane.b32.xlu1 %v1625_v32, %s1760_s29 }
 0x5f1   : > { %p1684_p7 = por %p1683_p6, %p1682_p5 }
 0x5f2   : > { %1121 = vmatpush.bf16.msrb.mxu2 %v1503_v29 }
 0x5f3   : > { %p1685_p8 = pnand %p1684_p7, %p1680_p4 }
 0x646   : > { %v1622_v36 = vpop.permute.xlu2 %1621 }
 0x647   : > { %v1624_v37 = vunpack.i.h.bf16 %v1622_v36  ;;  %v1623_v38 = vunpack.i.l.bf16 %v1622_v36 }
 0x649   : > { %v927_v50 = vsel %vm489_vm1, %v890_v47, %v1623_v38  ;;  %v928_v51 = vsel %vm489_vm1, %v876_v46, %v1624_v37 }
 0x662   : > { %v1627_v45 = vpop.permute.xlu1 %1626 }
 0x663   : > { %v1629_v48 = vunpack.i.h.bf16 %v1627_v45  ;;  %v1628_v49 = vunpack.i.l.bf16 %v1627_v45 }
 0x665   : > { %v930_v52 = vsel %vm929_vm0, %v927_v50, %v1628_v49  ;;  %v931_v53 = vsel %vm929_vm0, %v928_v51, %v1629_v48 }
 0x666   : > { %v932_v54 = vpack.c.bf16 %v931_v53, %v930_v52 }
 0x668   : > { %1433 = vmatmul.msk.bf16.vlgmr.msrb.gmra.mxu1 %vm970_vm2, %v932_v54 }
 0x6e5   : > { %v983_v0 = vpop.f32.mrf.mxu1 }
 0x6e6   : > { %v984_v2 = vadd.f32 %v983_v0, %v933_v63  ;;  %v468_v0 = vld [vmem:[%s1918_s26 + $0x8] sm:$0x3] }
 0x6e8   : > { %v988_v7 = vmax.f32 %v984_v2, 0.0 }
 0x6ea   : > { %v1014_v12 = vrot.slane %v988_v7, 7  ;;  %v1020_v14 = vrot.slane %v988_v7, 1 }
 0x6ed   : > { %v985_v8 = vpop.f32.mrf.mxu1 }
 0x6ee   : > { %v986_v9 = vadd.f32 %v985_v8, %v933_v63  ;;  %v1188_v8 = vperm.slane %v468_v0, 0 }
 0x6f0   : > { %v989_v11 = vmax.f32 %v986_v9, 0.0 }
 0x6f2   : > { %v1015_v15 = vrot.slane %v989_v11, 7  ;;  %v1021_v16 = vrot.slane %v989_v11, 1  ;;  %v1630_v17 = vpack.i.bf16 %v989_v11, %v988_v7 }
 0x6f4   : > { %v1022_v18 = vsel %vm894_vm12, %v1020_v14, %v1021_v16  ;;  %v1023_v20 = vsel %vm894_vm12, %v1021_v16, %v1020_v14  ;;  %1631 = vrot.lane.b32.xlu2 %v1630_v17, %s1760_s29  ;;  %v1016_v23 = vsel %vm875_vm14, %v1014_v12, %v1015_v15  ;;  %v1017_v26 = vsel %vm875_vm14, %v1015_v15, %v1014_v12 }
 0x6f5   : > { %v1025_v27 = vsel %vm902_vm13, %v1023_v20, 0.0  ;;  %v1018_v33 = vsel %vm880_vm15, %v1017_v26, 0.0 }
 0x6f6   : > { %v1037_v28 = vpack.c.bf16 %v1025_v27, %v1022_v18 }
 0x6f8   : > { %1482 = vmatmul.msk.bf16.vlgmr.msra.gmra.mxu3 %vm929_vm0, %v1037_v28 }
 0x74e   : > { %v1632_v30 = vpop.permute.xlu2 %1631 }
 0x74f   : > { %v1634_v31 = vunpack.i.h.bf16 %v1632_v30  ;;  %v1633_v32 = vunpack.i.l.bf16 %v1632_v30 }
 0x751   : > { %v1034_v34 = vsel %vm929_vm0, %v1018_v33, %v1633_v32  ;;  %v1035_v35 = vsel %vm929_vm0, %v1016_v23, %v1634_v31 }
 0x752   : > { %v1036_v13 = vpack.c.bf16 %v1035_v35, %v1034_v34 }
 0x754   : > { %1122 = vmatmul.bf16.vlgmr.msrb.gmra.mxu2 %v1036_v13 }
 0x77b   : > { %v1137_v39 = vpop.f32.mrf.mxu3 }
 0x783   : > { %v1139_v38 = vpop.f32.mrf.mxu3 }
 0x7d7   : > { %v1123_v40 = vpop.f32.mrf.mxu2 }
 0x7d8   : > { %v1124_v41 = vadd.f32 %v1123_v40, %v1038_v24 }
 0x7da   : > { %v1138_v42 = vadd.f32 %v1137_v39, %v1124_v41 }
 0x7dc   : > { %v1142_v36 = vadd.f32 %v1138_v42, %v2022_v22 }
 0x7de   : > { %v1144_v6 = vsel %vm489_vm1, %v1142_v36, 0.0 }
 0x7df   : > { %v1125_v37 = vpop.f32.mrf.mxu2  ;;  %1145 = vadd.xlane.f32.xlu1 %v1144_v6 }
 0x7e0   : > { %v1126_v43 = vadd.f32 %v1125_v37, %v1038_v24 }
 0x7e2   : > { %v1140_v44 = vadd.f32 %v1139_v38, %v1126_v43 }
 0x7e4   : > { %v1143_v45 = vadd.f32 %v1140_v44, %v2027_v25 }
 0x7e6   : > { %v1147_v46 = vsel %vm489_vm1, %v1143_v45, 0.0 }
 0x7e7   : > { %1148 = vadd.xlane.f32.xlu0 %v1147_v46 }
 0x852   : > { %v1146_v47 = vpop.xlane.xlu1 %1145 }
 0x853   : > { %v1150_v3 = vmul.f32 %v1146_v47, %v2002_v5 }
 0x855   : > { %v1152_v48 = vsub.f32 %v1142_v36, %v1150_v3 }
 0x857   : > { %v1154_v49 = vmul.f32 %v1152_v48, %v1152_v48 }
 0x859   : > { %v1156_v50 = vsel %vm489_vm1, %v1154_v49, 0.0 }
 0x85a   : > { %v1149_v22 = vpop.xlane.xlu0 %1148  ;;  %1157 = vadd.xlane.f32.xlu2 %v1156_v50 }
 0x85b   : > { %v1151_v51 = vmul.f32 %v1149_v22, %v2002_v5 }
 0x85d   : > { %v1153_v52 = vsub.f32 %v1143_v45, %v1151_v51 }
 0x85f   : > { %v1155_v53 = vmul.f32 %v1153_v52, %v1153_v52 }
 0x861   : > { %v1159_v54 = vsel %vm489_vm1, %v1155_v53, 0.0 }
 0x862   : > { %1160 = vadd.xlane.f32.xlu1 %v1159_v54 }
 0x8cd   : > { %v1158_v25 = vpop.xlane.xlu2 %1157 }
 0x8ce   : > { %v1162_v55 = vmul.f32 %v1158_v25, %v2002_v5 }
 0x8d0   : > { %v1164_v56 = vadd.f32 1e-05, %v1162_v55 }
 0x8d2   : > { %1657 = vrsqrt.f32 %v1164_v56  ;;  %vm1172_vm4 = vweird.f32 %v1164_v56 }
 0x8d5   : > { %v1161_v57 = vpop.xlane.xlu1 %1160 }
 0x8d6   : > { %v1163_v58 = vmul.f32 %v1161_v57, %v2002_v5  ;;  %v1191_v5 = vperm.slane %v468_v0, 1 }
 0x8d8   : > { %v1658_v59 = vpop.eup %1657  ;;  %v1165_v60 = vadd.f32 1e-05, %v1163_v58 }
 0x8d9   : > { %v1167_v61 = vmul.f32 %v1658_v59, %v1164_v56  ;;  %vm1173_vm3 = vweird.f32 %v1658_v59 }
 0x8da   : > { %1659 = vrsqrt.f32 %v1165_v60  ;;  %vm1174_vm5 = vmor %vm1172_vm4, %vm1173_vm3  ;;  %vm1182_vm7 = vweird.f32 %v1165_v60 }
 0x8db   : > { %v1168_v62 = vmul.f32 %v1658_v59, %v1167_v61 }
 0x8dd   : > { %v1169_v63 = vmul.f32 0.5, %v1168_v62 }
 0x8df   : > { %v1170_v1 = vsub.f32 1.5, %v1169_v63 }
 0x8e0   : > { %v1660_v2 = vpop.eup %1659 }
 0x8e1   : > { %v1171_v4 = vmul.f32 %v1658_v59, %v1170_v1  ;;  %v1177_v7 = vmul.f32 %v1660_v2, %v1165_v60  ;;  %vm1183_vm6 = vweird.f32 %v1660_v2 }
 0x8e2   : > { %vm1184_vm8 = vmor %vm1182_vm7, %vm1183_vm6 }
 0x8e3   : > { %v1175_v9 = vsel %vm1174_vm5, %v1658_v59, %v1171_v4  ;;  %v1178_v10 = vmul.f32 %v1660_v2, %v1177_v7 }
 0x8e4   : > { %v1186_v11 = vmul.f32 %v1175_v9, %v1152_v48 }
 0x8e5   : > { %v1179_v12 = vmul.f32 0.5, %v1178_v10 }
 0x8e6   : > { %v1189_v14 = vmul.f32 %v1188_v8, %v1186_v11 }
 0x8e7   : > { %v1180_v15 = vsub.f32 1.5, %v1179_v12 }
 0x8e8   : > { %v1192_v16 = vadd.f32 %v1191_v5, %v1189_v14 }
 0x8e9   : > { %v1181_v17 = vmul.f32 %v1660_v2, %v1180_v15 }
 0x8ea   : > { %v1194_v18 = vmul.f32 %v1192_v16, %v2017_v19 }
 0x8eb   : > { %v1185_v20 = vsel %vm1184_vm8, %v1660_v2, %v1181_v17 }
 0x8ec   : > { %1196 = vst.msk [vmem:[%s1925_s18] sm:$0xff] %vm489_vm1, %v1194_v18  ;;  %v1187_v23 = vmul.f32 %v1185_v20, %v1153_v52 }
 0x8ee   : > { %v1190_v26 = vmul.f32 %v1188_v8, %v1187_v23 }
 0x8f0   : > { %v1193_v27 = vadd.f32 %v1191_v5, %v1190_v26 }
 0x8f2   : > { %v1195_v28 = vmul.f32 %v1193_v27, %v2019_v21 }
 0x8f4   : > { %1197 = vst.msk [vmem:[%s1925_s18 + $0x8] sm:$0xff] %vm489_vm1, %v1195_v28 }
 0x8f5   : > { %1688 = shalt.err (!%p1685_p8)
}
 0x8f6   : > { %s1764_s18 = smov 128   ;;  %s1765_s8 = smov 8  }
 0x8f7   : > { %1518 = dma.vmem_to_hbm [thread:$0]  (%p1860_p3), %s1212_s13, 256, %s1214_s14, %s1199_s16, %s1764_s18, %s1764_s18, %s1765_s8  }
 0x8f8 PF: > { %s2202_s29 = sld [smem:[#allocation9_spill]] }
 0x8f9   : > { %s2203_s30 = sld [smem:[#allocation5_spill]] }
 0x8fe   : > { %p1524_p10 = scmp.ge.s32.totalorder %s2202_s29, 2 }
 0x8ff   : > { %s1228_s15 = sand.u32 1, %s2203_s30  }
 0x900   : > { %p1521_p11 = pnand %p1524_p10, %p1870_p9  ;;  %s1229_s17 = scalar_lea.sflag [#allocation3], %s1228_s15 }
 0x902   : > { %p1522_p12 = pneg %p1521_p11 }
 0x904   : > { %1722 = dma.done.wait (%p1522_p12), %s1229_s17, 256  }
 0x905   : > { %1724 = vsyncadd (%p1522_p12), %s1229_s17, 4294967040  ;;  %s21_s12 = sadd.s32 1, %s2202_s29   ;;  %s2205_s21 = sld [smem:[#allocation6_spill]] }
 0x906   : > { %p18_p13 = scmp.ge.s32.totalorder %s21_s12, 6   ;;  %s2206_s29 = sld [smem:[#allocation14_spill]] }
 0x907   : > { %s2207_s30 = sld [smem:[#allocation7_spill]]  ;;  %s2211_s27 = smov %s1731_s28 }
 0x908   : > { %s2208_s9 = sld [smem:[#allocation8_spill]]  ;;  %20 = sbr.rel (!%p18_p13) target bundleno = 9 (0x9), region = 112 }
 0x909   : > { %s2209_s10 = sld [smem:[#allocation10_spill]] }
 0x90a   : > { %s2210_s11 = sld [smem:[#allocation12_spill]] }
 0x90b   : > { %s2212_s28 = smov %s2205_s21 }
 0x90d   :  { %1235 = vsyncpa [#allocation3], 1 }
 0x90e   :  { %1237 = vsyncpa [#allocation3 + $0x1], 1 }

</bundles_post_ra>
